<compile_context>
chip_gen: v6e
topology: v6e:2x2x1
jax: 0.10.0
libtpu: 0.0.40
codegen_flags: <defaults>
</compile_context>

<pallas_src>
import jax
import jax.numpy as jnp
from jax import lax
from jax.experimental import pallas as pl
from jax.experimental.pallas import tpu as pltpu

BN_EPS = 1e-5
PREFERRED_TILE_M = 2048          # batch rows per grid step (sweep 1024-2048)
MIN_TILE_M = 256                 # multiple of 128 keeps x / output blocks aligned
VMEM_X_BUDGET = 16 * 1024 * 1024  # cap for the double-buffered f32 x block


def _pick_tile_m(batch, preferred=PREFERRED_TILE_M, multiple=MIN_TILE_M):
    """Largest tile <= `preferred`, but small enough that the grid has >= 2
    steps when the batch allows it (v7x megacore sharding of the batch axis)."""
    if batch <= multiple:
        return multiple
    half = pl.cdiv(batch, 2)
    return min(preferred, pl.cdiv(half, multiple) * multiple)


def _mlp_kernel(x_ref,
                w1_ref, b1_ref,
                w2_ref, b2_ref,
                w3_ref, b3_ref,
                w4_ref, b4_ref,
                o_ref):
    """x [tile_m, F_pad] f32; W1..W3 bf16 [in,out]; b1..b3 f32 [1,out];
    w4 bf16 [1,32]; b4 f32 (1,1) in SMEM; out f32 [1, tile_m] (batch on lanes)."""
    # In-kernel f32 -> bf16 cast (VPU, hidden under MXU/DMA slack); avoids a
    # separate XLA cast pass over x in HBM.
    h = x_ref[...].astype(jnp.bfloat16)

    # Layers 1-3: (BN-folded) Linear + ReLU.  f32 accumulate / bias / ReLU,
    # single bf16 cast per layer feeding the next MXU pass.
    for w_ref, b_ref in ((w1_ref, b1_ref), (w2_ref, b2_ref), (w3_ref, b3_ref)):
        h = jnp.dot(h, w_ref[...], preferred_element_type=jnp.float32) + b_ref[...]
        h = jnp.maximum(h, 0.0).astype(jnp.bfloat16)

    # Layer 4: Linear(32, 1), computed transposed (NT dot_general: contract the
    # 32-wide dim of both operands) so the tile's result is one lane-dense
    # [1, tile_m] row -- batch rows packed along lanes, unmasked vst.
    out_t = lax.dot_general(
        w4_ref[...], h,
        dimension_numbers=(((1,), (1,)), ((), ())),
        preferred_element_type=jnp.float32,
    ) + b4_ref[0, 0]
    o_ref[...] = out_t.astype(o_ref.dtype)


def mlp_classifier_forward(x, folded_params, *, tile_m=None):
    """x: [B, input_dim] float32. folded_params: output of fold_params()."""
    w1, b1, w2, b2, w3, b3, w4, b4 = folded_params
    x = x.astype(jnp.float32)
    B, F = x.shape
    F_pad = w1.shape[0]            # w1's input dim is already lane-padded
    assert F <= F_pad

    if tile_m is None:
        tile_m = _pick_tile_m(B)
    # VMEM guard (matters on v7x, 64 MiB): the double-buffered f32 x block is
    # the only tile that scales with input_dim; h1 [tile_m, 512] f32 (~4 MiB at
    # tile_m=2048) plus ~0.6 MiB of resident weights fit comfortably in the
    # remaining scoped-VMEM headroom, so vmem_limit_bytes is left at default.
    while tile_m > MIN_TILE_M and 2 * tile_m * F_pad * 4 > VMEM_X_BUDGET:
        tile_m //= 2

    n_tiles = pl.cdiv(B, tile_m)
    b_pad = n_tiles * tile_m

    if b_pad != B or F_pad != F:
        # Single fused pad covers both batch rounding and feature lane-padding.
        x = jnp.pad(x, ((0, b_pad - B), (0, F_pad - F)))

    def const_spec(a):
        # Full-array block, same block every grid step -> stays VMEM-resident
        # (Pallas skips re-DMA when the block index does not change).
        return pl.BlockSpec(a.shape, lambda i: (0, 0))

    out = pl.pallas_call(
        _mlp_kernel,
        out_shape=jax.ShapeDtypeStruct((1, b_pad), jnp.float32),
        grid=(n_tiles,),
        in_specs=[pl.BlockSpec((tile_m, F_pad), lambda i: (i, 0)),
                  const_spec(w1), const_spec(b1),
                  const_spec(w2), const_spec(b2),
                  const_spec(w3), const_spec(b3),
                  const_spec(w4),
                  pl.BlockSpec(memory_space=pltpu.MemorySpace.SMEM)],
        out_specs=pl.BlockSpec((1, tile_m), lambda i: (0, i)),
        compiler_params=pltpu.CompilerParams(
            # Batch axis is embarrassingly parallel -> megacore sharding on v7x.
            dimension_semantics=("parallel",),
        ),
    )(x, w1, b1, w2, b2, w3, b3, w4, b4)

    return out[0, :B].reshape(B, 1)


def init_params(key, input_dim):
    """Deterministic parameters mirroring the PyTorch module's shapes.

    Linear weights are stored as [in, out] (transposed vs. PyTorch [out, in]).
    BN params are stored as [1, features].
    """
    dims = [input_dim, 512, 128, 32, 1]
    params = []
    keys = jax.random.split(key, 16)
    ki = 0
    for li in range(4):
        fan_in, fan_out = dims[li], dims[li + 1]
        bound = 1.0 / jnp.sqrt(jnp.float32(fan_in))
        w = jax.random.uniform(keys[ki], (fan_in, fan_out), jnp.float32,
                               -bound, bound); ki += 1
        b = jax.random.uniform(keys[ki], (1, fan_out), jnp.float32,
                               -bound, bound); ki += 1
        params.extend([w, b])
        if li < 3:  # BatchNorm1d after the first three Linear layers
            gamma = 1.0 + 0.1 * jax.random.normal(keys[ki], (1, fan_out),
                                                  jnp.float32); ki += 1
            beta = 0.1 * jax.random.normal(keys[ki], (1, fan_out),
                                           jnp.float32); ki += 1
            rmean = 0.05 * jnp.ones((1, fan_out), jnp.float32)
            rvar = 0.9 * jnp.ones((1, fan_out), jnp.float32)
            params.extend([gamma, beta, rmean, rvar])
    return tuple(params)


def fold_params(params):
    """One-time host-side transform: fold eval-mode BN + bias into W / b.

    Returns (w1,b1,w2,b2,w3,b3,w4_row,b4) with bf16 weights (MXU path), f32
    biases, w1's input dim zero-padded to a multiple of 128, and the final
    layer stored as a bf16 [1, 32] row plus a (1, 1) f32 scalar bias.
    """
    (w1, b1, g1, be1, m1, v1,
     w2, b2, g2, be2, m2, v2,
     w3, b3, g3, be3, m3, v3,
     w4, b4) = params

    def fold(w, b, g, be, m, v):
        scale = g / jnp.sqrt(v + BN_EPS)            # [1, out]
        w_f = (w * scale).astype(jnp.bfloat16)      # [in, out]
        b_f = ((b - m) * scale + be).astype(jnp.float32)
        return w_f, b_f

    w1f, b1f = fold(w1, b1, g1, be1, m1, v1)
    w2f, b2f = fold(w2, b2, g2, be2, m2, v2)
    w3f, b3f = fold(w3, b3, g3, be3, m3, v3)

    # Zero-pad W1's input dim to the next multiple of 128 once (x is padded to
    # match per call, usually fused with the batch-rounding pad).
    f_in = w1f.shape[0]
    f_pad = ((f_in + 127) // 128) * 128
    if f_pad != f_in:
        w1f = jnp.pad(w1f, ((0, f_pad - f_in), (0, 0)))

    w4_row = jnp.transpose(w4).astype(jnp.bfloat16)   # [1, 32]
    b4_s = b4.astype(jnp.float32)                     # [1, 1] (SMEM scalar)

    return (w1f, b1f, w2f, b2f, w3f, b3f, w4_row, b4_s)


def reference_forward_f32(x, params):
    """Pure-JAX f32 eval-mode reference (PyTorch semantics)."""
    (w1, b1, g1, be1, m1, v1,
     w2, b2, g2, be2, m2, v2,
     w3, b3, g3, be3, m3, v3,
     w4, b4) = params

    def bn_relu(h, g, be, m, v):
        return jnp.maximum((h - m) * g / jnp.sqrt(v + BN_EPS) + be, 0.0)

    h = bn_relu(x @ w1 + b1, g1, be1, m1, v1)
    h = bn_relu(h @ w2 + b2, g2, be2, m2, v2)
    h = bn_relu(h @ w3 + b3, g3, be3, m3, v3)
    return h @ w4 + b4


def reference_forward_folded(x, folded_params):
    """Pure-JAX reference matching the kernel's bf16-matmul / f32-epilogue path."""
    w1, b1, w2, b2, w3, b3, w4_row, b4 = folded_params
    F = x.shape[1]
    h = x.astype(jnp.bfloat16)
    h = jnp.maximum(jnp.dot(h, w1[:F], preferred_element_type=jnp.float32) + b1, 0.0)
    h = jnp.maximum(jnp.dot(h.astype(jnp.bfloat16), w2,
                            preferred_element_type=jnp.float32) + b2, 0.0)
    h = jnp.maximum(jnp.dot(h.astype(jnp.bfloat16), w3,
                            preferred_element_type=jnp.float32) + b3, 0.0)
    return jnp.dot(h.astype(jnp.bfloat16), jnp.transpose(w4_row),
                   preferred_element_type=jnp.float32) + b4


if __name__ == "__main__":
    key = jax.random.PRNGKey(0)
    k_x, k_p = jax.random.split(key)

    B, INPUT_DIM = 8, 64
    x = jax.random.normal(k_x, (B, INPUT_DIM), jnp.float32)
    params = init_params(k_p, INPUT_DIM)
    folded = fold_params(params)   # one-time host-side BN/bias folding

    fwd = jax.jit(lambda xx: mlp_classifier_forward(xx, folded))
    out = jax.block_until_ready(fwd(x))
    assert out.shape == (B, 1)

    # Tight check vs. the bf16-matmul / f32-accumulate reference (same numerics).
    ref_bf16 = reference_forward_folded(x, folded)
    assert jnp.allclose(out, ref_bf16, atol=2e-3, rtol=2e-3), \
        "mismatch vs bf16 folded reference"

    # Loose check vs. the full-f32 PyTorch-semantics reference (bf16 rounding).
    ref_f32 = reference_forward_f32(x, params)
    assert jnp.allclose(out, ref_f32, atol=5e-2, rtol=5e-2), \
        "mismatch vs f32 eval-mode reference"

    # Multi-tile path: B=600 -> tile_m=512, 2 grid steps (exercises v7x
    # megacore sharding) with fused batch + feature padding.
    B2 = 600
    x2 = jax.random.normal(jax.random.PRNGKey(1), (B2, INPUT_DIM), jnp.float32)
    out2 = jax.block_until_ready(mlp_classifier_forward(x2, folded))
    assert out2.shape == (B2, 1)
    ref2 = reference_forward_folded(x2, folded)
    assert jnp.allclose(out2, ref2, atol=2e-3, rtol=2e-3), \
        "mismatch vs reference (multi-tile)"

    # Large-batch path: exercises the preferred 2048-row tile + batch padding.
    B3 = 4500
    x3 = jax.random.normal(jax.random.PRNGKey(2), (B3, INPUT_DIM), jnp.float32)
    out3 = jax.block_until_ready(mlp_classifier_forward(x3, folded))
    assert out3.shape == (B3, 1)
    ref3 = reference_forward_folded(x3, folded)
    assert jnp.allclose(out3, ref3, atol=2e-3, rtol=2e-3), \
        "mismatch vs reference (large batch)"

    print("KERNEL_OK")
</pallas_src>

<mosaic_0001>
module attributes {stable_mosaic.version = 11 : i64} {
  func.func @_mlp_kernel(%arg0: i32, %arg1: memref<256x128xf32, #tpu.memory_space<vmem>>, %arg2: memref<128x512xbf16, #tpu.memory_space<vmem>>, %arg3: memref<1x512xf32, #tpu.memory_space<vmem>>, %arg4: memref<512x128xbf16, #tpu.memory_space<vmem>>, %arg5: memref<1x128xf32, #tpu.memory_space<vmem>>, %arg6: memref<128x32xbf16, #tpu.memory_space<vmem>>, %arg7: memref<1x32xf32, #tpu.memory_space<vmem>>, %arg8: memref<1x32xbf16, #tpu.memory_space<vmem>>, %arg9: memref<1x1xf32, #tpu.memory_space<smem>>, %arg10: memref<1x256xf32, #tpu.memory_space<vmem>>) attributes {dimension_semantics = [#tpu.dimension_semantics<parallel>], iteration_bounds = array<i64: 1>, scalar_prefetch = 0 : i64, scratch_operands = 0 : i64, tpu.core_type = #tpu.core_type<tc>, window_params = [{transform_indices = @transform_0, window_bounds = array<i64: 256, 128>}, {pipeline_mode = #tpu.pipeline_mode<synchronous>, transform_indices = @transform_1, window_bounds = array<i64: 128, 512>}, {pipeline_mode = #tpu.pipeline_mode<synchronous>, transform_indices = @transform_2, window_bounds = array<i64: 1, 512>}, {pipeline_mode = #tpu.pipeline_mode<synchronous>, transform_indices = @transform_3, window_bounds = array<i64: 512, 128>}, {pipeline_mode = #tpu.pipeline_mode<synchronous>, transform_indices = @transform_4, window_bounds = array<i64: 1, 128>}, {pipeline_mode = #tpu.pipeline_mode<synchronous>, transform_indices = @transform_5, window_bounds = array<i64: 128, 32>}, {pipeline_mode = #tpu.pipeline_mode<synchronous>, transform_indices = @transform_6, window_bounds = array<i64: 1, 32>}, {pipeline_mode = #tpu.pipeline_mode<synchronous>, transform_indices = @transform_7, window_bounds = array<i64: 1, 32>}, {transform_indices = @transform_8, window_bounds = array<i64: 1, 1>}, {transform_indices = @transform_9, window_bounds = array<i64: 1, 256>}]} {
    %c0 = arith.constant 0 : index
    %c0_0 = arith.constant 0 : index
    %0 = vector.load %arg1[%c0, %c0_0] : memref<256x128xf32, #tpu.memory_space<vmem>>, vector<256x128xf32>
    %1 = arith.truncf %0 : vector<256x128xf32> to vector<256x128xbf16>
    %c0_1 = arith.constant 0 : index
    %c0_2 = arith.constant 0 : index
    %2 = vector.load %arg2[%c0_1, %c0_2] : memref<128x512xbf16, #tpu.memory_space<vmem>>, vector<128x512xbf16>
    %cst = arith.constant dense<0.000000e+00> : vector<256x512xf32>
    %3 = tpu.matmul %1, %2, %cst {dimension_numbers = #tpu.dot_dimension_numbers<[1], [0], [0], [1], [0, 0, 1, 1], [], []>} : vector<256x128xbf16>, vector<128x512xbf16>, vector<256x512xf32> -> vector<256x512xf32>
    %c0_3 = arith.constant 0 : index
    %c0_4 = arith.constant 0 : index
    %4 = vector.load %arg3[%c0_3, %c0_4] : memref<1x512xf32, #tpu.memory_space<vmem>>, vector<1x512xf32>
    %5 = vector.broadcast %4 : vector<1x512xf32> to vector<256x512xf32>
    %6 = arith.addf %3, %5 : vector<256x512xf32>
    %cst_5 = arith.constant 0.000000e+00 : f32
    %7 = vector.broadcast %cst_5 : f32 to vector<256x512xf32>
    %8 = arith.maximumf %6, %7 : vector<256x512xf32>
    %9 = arith.truncf %8 : vector<256x512xf32> to vector<256x512xbf16>
    %c0_6 = arith.constant 0 : index
    %c0_7 = arith.constant 0 : index
    %10 = vector.load %arg4[%c0_6, %c0_7] : memref<512x128xbf16, #tpu.memory_space<vmem>>, vector<512x128xbf16>
    %cst_8 = arith.constant dense<0.000000e+00> : vector<256x128xf32>
    %11 = tpu.matmul %9, %10, %cst_8 {dimension_numbers = #tpu.dot_dimension_numbers<[1], [0], [0], [1], [0, 0, 1, 1], [], []>} : vector<256x512xbf16>, vector<512x128xbf16>, vector<256x128xf32> -> vector<256x128xf32>
    %c0_9 = arith.constant 0 : index
    %c0_10 = arith.constant 0 : index
    %12 = vector.load %arg5[%c0_9, %c0_10] : memref<1x128xf32, #tpu.memory_space<vmem>>, vector<1x128xf32>
    %13 = vector.broadcast %12 : vector<1x128xf32> to vector<256x128xf32>
    %14 = arith.addf %11, %13 : vector<256x128xf32>
    %cst_11 = arith.constant 0.000000e+00 : f32
    %15 = vector.broadcast %cst_11 : f32 to vector<256x128xf32>
    %16 = arith.maximumf %14, %15 : vector<256x128xf32>
    %17 = arith.truncf %16 : vector<256x128xf32> to vector<256x128xbf16>
    %c0_12 = arith.constant 0 : index
    %c0_13 = arith.constant 0 : index
    %18 = vector.load %arg6[%c0_12, %c0_13] : memref<128x32xbf16, #tpu.memory_space<vmem>>, vector<128x32xbf16>
    %cst_14 = arith.constant dense<0.000000e+00> : vector<256x32xf32>
    %19 = tpu.matmul %17, %18, %cst_14 {dimension_numbers = #tpu.dot_dimension_numbers<[1], [0], [0], [1], [0, 0, 1, 1], [], []>} : vector<256x128xbf16>, vector<128x32xbf16>, vector<256x32xf32> -> vector<256x32xf32>
    %c0_15 = arith.constant 0 : index
    %c0_16 = arith.constant 0 : index
    %20 = vector.load %arg7[%c0_15, %c0_16] : memref<1x32xf32, #tpu.memory_space<vmem>>, vector<1x32xf32>
    %21 = vector.broadcast %20 : vector<1x32xf32> to vector<256x32xf32>
    %22 = arith.addf %19, %21 : vector<256x32xf32>
    %cst_17 = arith.constant 0.000000e+00 : f32
    %23 = vector.broadcast %cst_17 : f32 to vector<256x32xf32>
    %24 = arith.maximumf %22, %23 : vector<256x32xf32>
    %25 = arith.truncf %24 : vector<256x32xf32> to vector<256x32xbf16>
    %c0_18 = arith.constant 0 : index
    %c0_19 = arith.constant 0 : index
    %26 = vector.load %arg8[%c0_18, %c0_19] : memref<1x32xbf16, #tpu.memory_space<vmem>>, vector<1x32xbf16>
    %cst_20 = arith.constant dense<0.000000e+00> : vector<1x256xf32>
    %27 = tpu.matmul %26, %25, %cst_20 {dimension_numbers = #tpu.dot_dimension_numbers<[1], [1], [0], [0], [0, 0, 1, 0], [], []>} : vector<1x32xbf16>, vector<256x32xbf16>, vector<1x256xf32> -> vector<1x256xf32>
    %c0_21 = arith.constant 0 : index
    %c0_22 = arith.constant 0 : index
    %28 = memref.load %arg9[%c0_21, %c0_22] : memref<1x1xf32, #tpu.memory_space<smem>>
    %29 = vector.broadcast %28 : f32 to vector<1x256xf32>
    %30 = arith.addf %27, %29 : vector<1x256xf32>
    %c0_23 = arith.constant 0 : index
    %c0_24 = arith.constant 0 : index
    %31 = vector.load %arg10[%c0_23, %c0_24] : memref<1x256xf32, #tpu.memory_space<vmem>>, vector<1x256xf32>
    tpu.vector_store %arg10[%c0_23, %c0_24], %30 {strides = array<i32>} : memref<1x256xf32, #tpu.memory_space<vmem>>, vector<1x256xf32>,
    return
  }
  func.func @transform_0(%arg0: i32) -> (i32, i32) {
    %c0_i32 = arith.constant 0 : i32
    %c0_i32_0 = arith.constant 0 : i32
    return %arg0, %c0_i32 : i32, i32
  }
  func.func @transform_1(%arg0: i32) -> (i32, i32) {
    %c0_i32 = arith.constant 0 : i32
    %c0_i32_0 = arith.constant 0 : i32
    %c0_i32_1 = arith.constant 0 : i32
    return %c0_i32, %c0_i32_0 : i32, i32
  }
  func.func @transform_2(%arg0: i32) -> (i32, i32) {
    %c0_i32 = arith.constant 0 : i32
    %c0_i32_0 = arith.constant 0 : i32
    %c0_i32_1 = arith.constant 0 : i32
    return %c0_i32, %c0_i32_0 : i32, i32
  }
  func.func @transform_3(%arg0: i32) -> (i32, i32) {
    %c0_i32 = arith.constant 0 : i32
    %c0_i32_0 = arith.constant 0 : i32
    %c0_i32_1 = arith.constant 0 : i32
    return %c0_i32, %c0_i32_0 : i32, i32
  }
  func.func @transform_4(%arg0: i32) -> (i32, i32) {
    %c0_i32 = arith.constant 0 : i32
    %c0_i32_0 = arith.constant 0 : i32
    %c0_i32_1 = arith.constant 0 : i32
    return %c0_i32, %c0_i32_0 : i32, i32
  }
  func.func @transform_5(%arg0: i32) -> (i32, i32) {
    %c0_i32 = arith.constant 0 : i32
    %c0_i32_0 = arith.constant 0 : i32
    %c0_i32_1 = arith.constant 0 : i32
    return %c0_i32, %c0_i32_0 : i32, i32
  }
  func.func @transform_6(%arg0: i32) -> (i32, i32) {
    %c0_i32 = arith.constant 0 : i32
    %c0_i32_0 = arith.constant 0 : i32
    %c0_i32_1 = arith.constant 0 : i32
    return %c0_i32, %c0_i32_0 : i32, i32
  }
  func.func @transform_7(%arg0: i32) -> (i32, i32) {
    %c0_i32 = arith.constant 0 : i32
    %c0_i32_0 = arith.constant 0 : i32
    %c0_i32_1 = arith.constant 0 : i32
    return %c0_i32, %c0_i32_0 : i32, i32
  }
  func.func @transform_8(%arg0: i32) -> (i32, i32) {
    %c0_i32 = arith.constant 0 : i32
    %c0_i32_0 = arith.constant 0 : i32
    %c0_i32_1 = arith.constant 0 : i32
    return %c0_i32, %c0_i32_0 : i32, i32
  }
  func.func @transform_9(%arg0: i32) -> (i32, i32) {
    %c0_i32 = arith.constant 0 : i32
    %c0_i32_0 = arith.constant 0 : i32
    return %c0_i32, %arg0 : i32, i32
  }
}

</mosaic_0001>

<bundles_post_ra>
// kernel: _lambda_.1
= control target key start
LH: loop header
LB: loop body
LE: loop exit
PB: predicated region body
PF: predicated region fallthrough
CT: control target
= control target key end

     0   :  { %15 = vsyncpa [#allocation4], 0  ;;  %s3051_s0 = inlined_call_operand.vmem [shape: f32[256,128], index: 0, kind: input, shape index: {}]   ;;  %s3052_s1 = inlined_call_operand.hbm [shape: bf16[128,512], index: 1, kind: input, shape index: {}]   ;;  %s3053_s2 = inlined_call_operand.vmem [shape: f32[1,512], index: 2, kind: input, shape index: {}]   ;;  %s3054_s3 = inlined_call_operand.vmem [shape: bf16[512,128], index: 3, kind: input, shape index: {}]   ;;  %s3055_s4 = inlined_call_operand.vmem [shape: f32[1,128], index: 4, kind: input, shape index: {}]   ;;  %s3056_s5 = inlined_call_operand.hbm [shape: bf16[128,32], index: 5, kind: input, shape index: {}]   ;;  %s3057_s6 = inlined_call_operand.vmem [shape: f32[1,32], index: 6, kind: input, shape index: {}]   ;;  %s3058_s7 = inlined_call_operand.vmem [shape: bf16[1,32], index: 7, kind: input, shape index: {}]   ;;  %s3059_s8 = inlined_call_operand.<no memory space> [shape: f32[1,1], index: 8, kind: input, shape index: {}]   ;;  %s3060_s9 = inlined_call_operand.vmem [shape: f32[1,256], index: 9, kind: output, shape index: {}]  }
   0x1   :  { %16 = vsyncpa [#allocation6], 0  ;;  %s2477_s30 = smov [#allocation3]  }
   0x2   :  { %s24_s10 = sshll.u32 %s2477_s30, 4  ;;  %s25_s10 = int_to_ptr.vmem [resolvable:$true] %s24_s10 }
   0x3   :  { %s2441_s11 = scalar_lea.vmem %s25_s10, 4096  ;;  %p2446_p1 = scmp.lt.s32.totalorder %s25_s10, %s25_s10 }
   0x4   :  { %p2442_p0 = scmp.ne.s32.totalorder %s25_s10, %s2441_s11  ;;  %p2447_p2 = scmp.lt.s32.totalorder %s2441_s11, %s2441_s11 }
   0x6   :  { %p2448_p3 = por %p2447_p2, %p2446_p1 }
   0x8   :  { %p2449_p4 = pnand %p2448_p3, %p2442_p0 }
   0xa   :  { %2452 = shalt.err (!%p2449_p4)
}
   0xb   :  { %s2478_s12 = smov 256   ;;  %s2479_s13 = smov 16  }
   0xc   :  { %30 = dma.hbm_to_vmem [thread:$0]  %s3052_s1, 4096, %s25_s10, [#allocation4], %s2478_s12, %s2478_s12, %s2479_s13  }
   0xd   :  { %s2480_s16 = smov [#allocation5]  }
   0xe   :  { %s42_s17 = sshll.u32 %s2480_s16, 4  ;;  %s43_s17 = int_to_ptr.vmem [resolvable:$true] %s42_s17 }
   0xf   :  { %s2461_s18 = scalar_lea.vmem %s43_s17, 1024  ;;  %p2466_p6 = scmp.lt.s32.totalorder %s43_s17, %s43_s17 }
  0x10   :  { %p2462_p5 = scmp.ne.s32.totalorder %s43_s17, %s2461_s18  ;;  %p2467_p7 = scmp.lt.s32.totalorder %s2461_s18, %s2461_s18 }
  0x12   :  { %p2468_p8 = por %p2467_p7, %p2466_p6 }
  0x14   :  { %p2469_p9 = pnand %p2468_p8, %p2462_p5 }
  0x16   :  { %2472 = shalt.err (!%p2469_p9)
}
  0x17   :  { %s2481_s19 = smov 64   ;;  %s2482_s20 = smov 4  }
  0x18   :  { %48 = dma.hbm_to_vmem [thread:$0]  %s3056_s5, 1024, %s43_s17, [#allocation6], %s2481_s19, %s2481_s19, %s2482_s20  }
  0x19   :  { %2473 = dma.done.wait [#allocation4], 4096  }
  0x1a   :  { %2474 = vsyncadd [#allocation4], 4294963200 }
  0x1b   :  { %2475 = dma.done.wait [#allocation6], 1024  }
  0x1c   :  { %2476 = vsyncadd [#allocation6], 4294966272  ;;  %v2483_v0 = vmov 0   ;;  %v2345_v1 = vld [vmem:[#allocation3 + $0xe4] ss:$16 sps:$4 sm:$0xff]   ;;  %v63_v34 = vld [vmem:[%s3051_s0 + $0x8] sm:$0xff] }
  0x1d   :  { %356 = vmatprep.mubr.bf16.mxu0 %v2483_v0  ;;  %549 = vmatprep.mubr.bf16.mxu1 %v2483_v0  ;;  %v2347_v2 = vld [vmem:[#allocation3 + $0xec] ss:$16 sps:$4 sm:$0xff]   ;;  %v2349_v3 = vld [vmem:[#allocation3 + $0xe0] ss:$16 sps:$4 sm:$0xff]   ;;  %v2350_v4 = vld [vmem:[#allocation3 + $0xe8] ss:$16 sps:$4 sm:$0xff]  }
  0x1e   :  { %324 = vmatprep.subr.bf16.mxu0 %v2345_v1  ;;  %517 = vmatprep.subr.bf16.mxu1 %v2347_v2  ;;  %v2351_v5 = vld [vmem:[#allocation3 + $0xc4] ss:$16 sps:$4 sm:$0xff]   ;;  %v2353_v6 = vld [vmem:[#allocation3 + $0xcc] ss:$16 sps:$4 sm:$0xff]   ;;  %v2355_v7 = vld [vmem:[#allocation3 + $0xc0] ss:$16 sps:$4 sm:$0xff]  }
  0x1f   :  { %325 = vmatpush1.bf16.msra.mxu0 %v2349_v3  ;;  %518 = vmatpush1.bf16.msra.mxu1 %v2350_v4  ;;  %v2356_v8 = vld [vmem:[#allocation3 + $0xc8] ss:$16 sps:$4 sm:$0xff]   ;;  %v2357_v9 = vld [vmem:[#allocation3 + $0xa4] ss:$16 sps:$4 sm:$0xff]   ;;  %v2359_v10 = vld [vmem:[#allocation3 + $0xac] ss:$16 sps:$4 sm:$0xff]  }
  0x20   :  { %326 = vmatprep.subr.bf16.mxu0 %v2351_v5  ;;  %519 = vmatprep.subr.bf16.mxu1 %v2353_v6  ;;  %v2361_v11 = vld [vmem:[#allocation3 + $0xa0] ss:$16 sps:$4 sm:$0xff]   ;;  %v2362_v12 = vld [vmem:[#allocation3 + $0xa8] ss:$16 sps:$4 sm:$0xff]   ;;  %v2363_v13 = vld [vmem:[#allocation3 + $0x84] ss:$16 sps:$4 sm:$0xff]  }
  0x21   :  { %v2365_v14 = vld [vmem:[#allocation3 + $0x8c] ss:$16 sps:$4 sm:$0xff]   ;;  %v2367_v15 = vld [vmem:[#allocation3 + $0x80] ss:$16 sps:$4 sm:$0xff]   ;;  %v2368_v16 = vld [vmem:[#allocation3 + $0x88] ss:$16 sps:$4 sm:$0xff]  }
  0x22   :  { %v2369_v17 = vld [vmem:[#allocation3 + $0x64] ss:$16 sps:$4 sm:$0xff]   ;;  %v2371_v18 = vld [vmem:[#allocation3 + $0x6c] ss:$16 sps:$4 sm:$0xff]   ;;  %v2373_v19 = vld [vmem:[#allocation3 + $0x60] ss:$16 sps:$4 sm:$0xff]  }
  0x23   :  { %327 = vmatpush1.bf16.msra.mxu0 %v2355_v7  ;;  %520 = vmatpush1.bf16.msra.mxu1 %v2356_v8  ;;  %v2374_v20 = vld [vmem:[#allocation3 + $0x68] ss:$16 sps:$4 sm:$0xff]   ;;  %v2375_v21 = vld [vmem:[#allocation3 + $0x44] ss:$16 sps:$4 sm:$0xff]   ;;  %v2377_v22 = vld [vmem:[#allocation3 + $0x4c] ss:$16 sps:$4 sm:$0xff]  }
  0x24   :  { %328 = vmatprep.subr.bf16.mxu0 %v2357_v9  ;;  %521 = vmatprep.subr.bf16.mxu1 %v2359_v10  ;;  %v2379_v23 = vld [vmem:[#allocation3 + $0x40] ss:$16 sps:$4 sm:$0xff]   ;;  %v2380_v24 = vld [vmem:[#allocation3 + $0x48] ss:$16 sps:$4 sm:$0xff]   ;;  %v2381_v25 = vld [vmem:[#allocation3 + $0x24] ss:$16 sps:$4 sm:$0xff]  }
  0x25   :  { %v2383_v26 = vld [vmem:[#allocation3 + $0x2c] ss:$16 sps:$4 sm:$0xff]   ;;  %v2385_v27 = vld [vmem:[#allocation3 + $0x20] ss:$16 sps:$4 sm:$0xff]   ;;  %v2386_v28 = vld [vmem:[#allocation3 + $0x28] ss:$16 sps:$4 sm:$0xff]  }
  0x26   :  { %v2387_v29 = vld [vmem:[#allocation3 + $0x4] ss:$16 sps:$4 sm:$0xff]   ;;  %v2389_v30 = vld [vmem:[#allocation3 + $0xc] ss:$16 sps:$4 sm:$0xff]   ;;  %v2391_v31 = vld [vmem:[#allocation3] ss:$16 sps:$4 sm:$0xff]  }
  0x27   :  { %329 = vmatpush1.bf16.msra.mxu0 %v2361_v11  ;;  %522 = vmatpush1.bf16.msra.mxu1 %v2362_v12  ;;  %v2392_v32 = vld [vmem:[#allocation3 + $0x8] ss:$16 sps:$4 sm:$0xff]   ;;  %v62_v33 = vld [vmem:[%s3051_s0] sm:$0xff]  ;;  %v64_v38 = vld [vmem:[%s3051_s0 + $0x10] sm:$0xff]  ;;  %vm1818_vm0 = vcmask 261120  }
  0x28   :  { %330 = vmatprep.subr.bf16.mxu0 %v2363_v13  ;;  %523 = vmatprep.subr.bf16.mxu1 %v2365_v14  ;;  %v94_v35 = vpack.c.bf16 %v63_v34, %v62_v33  ;;  %v2393_v36 = vld [vmem:[%s3054_s3 + $0x78] sm:$0xff]   ;;  %v2397_v42 = vld [vmem:[%s3054_s3 + $0x70] sm:$0xff]   ;;  %v2401_v47 = vld [vmem:[%s3054_s3 + $0x68] sm:$0xff]  }
  0x29   :  { %v2394_v37 = vld [vmem:[%s3054_s3 + $0x38] sm:$0xff]   ;;  %v2398_v43 = vld [vmem:[%s3054_s3 + $0x30] sm:$0xff]   ;;  %v2402_v48 = vld [vmem:[%s3054_s3 + $0x28] sm:$0xff]  }
  0x2a   :  { %v65_v39 = vld [vmem:[%s3051_s0 + $0x18] sm:$0xff]  ;;  %v2399_v44 = vld [vmem:[%s3054_s3 + $0xf0] sm:$0xff]   ;;  %v66_v49 = vld [vmem:[%s3051_s0 + $0x20] sm:$0xff] }
  0x2b   :  { %331 = vmatpush1.bf16.msra.mxu0 %v2367_v15  ;;  %524 = vmatpush1.bf16.msra.mxu1 %v2368_v16  ;;  %v2395_v40 = vld [vmem:[%s3054_s3 + $0xf8] sm:$0xff]   ;;  %v95_v45 = vpack.c.bf16 %v65_v39, %v64_v38  ;;  %v2400_v46 = vld [vmem:[%s3054_s3 + $0xb0] sm:$0xff]   ;;  %v67_v50 = vld [vmem:[%s3051_s0 + $0x28] sm:$0xff] }
  0x2c   :  { %332 = vmatprep.subr.bf16.mxu0 %v2369_v17  ;;  %525 = vmatprep.subr.bf16.mxu1 %v2371_v18  ;;  %v2396_v41 = vld [vmem:[%s3054_s3 + $0xb8] sm:$0xff]   ;;  %v2403_v51 = vld [vmem:[%s3054_s3 + $0xe8] sm:$0xff]   ;;  %v2405_v53 = vld [vmem:[%s3054_s3 + $0x60] sm:$0xff]   ;;  %v96_v56 = vpack.c.bf16 %v67_v50, %v66_v49  ;;  %v144_v50 = vlaneseq }
  0x2d   :  { %v2404_v52 = vld [vmem:[%s3054_s3 + $0xa8] sm:$0xff]   ;;  %v2406_v54 = vld [vmem:[%s3054_s3 + $0xe0] sm:$0xff]   ;;  %v2409_v58 = vld [vmem:[%s3054_s3 + $0x58] sm:$0xff]  }
  0x2e   :  { %v2407_v55 = vld [vmem:[%s3054_s3 + $0x20] sm:$0xff]   ;;  %v2410_v59 = vld [vmem:[%s3054_s3 + $0xd8] sm:$0xff]   ;;  %v68_v60 = vld [vmem:[%s3051_s0 + $0x30] sm:$0xff]  ;;  %vm1931_vm1 = vcmp.lt.s32.totalorder %v144_v50, 256 }
  0x2f   :  { %333 = vmatpush1.bf16.msra.mxu0 %v2373_v19  ;;  %526 = vmatpush1.bf16.msra.mxu1 %v2374_v20  ;;  %v2408_v57 = vld [vmem:[%s3054_s3 + $0xa0] sm:$0xff]   ;;  %v2411_v61 = vld [vmem:[%s3054_s3 + $0x18] sm:$0xff]   ;;  %v71_v3 = vld [vmem:[%s3051_s0 + $0x48] sm:$0xff] }
  0x30   :  { %334 = vmatprep.subr.bf16.mxu0 %v2375_v21  ;;  %527 = vmatprep.subr.bf16.mxu1 %v2377_v22  ;;  %v2412_v62 = vld [vmem:[%s3054_s3 + $0x98] sm:$0xff]   ;;  %v70_v2 = vld [vmem:[%s3051_s0 + $0x40] sm:$0xff]  ;;  %v72_v5 = vld [vmem:[%s3051_s0 + $0x50] sm:$0xff] }
  0x31   :  { %v69_v63 = vld [vmem:[%s3051_s0 + $0x38] sm:$0xff]  ;;  %v98_v4 = vpack.c.bf16 %v71_v3, %v70_v2  ;;  %v74_v8 = vld [vmem:[%s3051_s0 + $0x60] sm:$0xff]  ;;  %v75_v9 = vld [vmem:[%s3051_s0 + $0x68] sm:$0xff] }
  0x32   :  { %v97_v1 = vpack.c.bf16 %v69_v63, %v68_v60  ;;  %v73_v6 = vld [vmem:[%s3051_s0 + $0x58] sm:$0xff]  ;;  %v100_v10 = vpack.c.bf16 %v75_v9, %v74_v8  ;;  %v76_v11 = vld [vmem:[%s3051_s0 + $0x70] sm:$0xff]  ;;  %v78_v14 = vld [vmem:[%s3051_s0 + $0x80] sm:$0xff] }
  0x33   :  { %335 = vmatpush1.bf16.msra.mxu0 %v2379_v23  ;;  %528 = vmatpush1.bf16.msra.mxu1 %v2380_v24  ;;  %v99_v7 = vpack.c.bf16 %v73_v6, %v72_v5  ;;  %v77_v12 = vld [vmem:[%s3051_s0 + $0x78] sm:$0xff]  ;;  %v79_v15 = vld [vmem:[%s3051_s0 + $0x88] sm:$0xff]  ;;  %v80_v17 = vld [vmem:[%s3051_s0 + $0x90] sm:$0xff] }
  0x34   :  { %336 = vmatprep.subr.bf16.mxu0 %v2381_v25  ;;  %529 = vmatprep.subr.bf16.mxu1 %v2383_v26  ;;  %v101_v13 = vpack.c.bf16 %v77_v12, %v76_v11  ;;  %v102_v16 = vpack.c.bf16 %v79_v15, %v78_v14  ;;  %v2413_v18 = vld [vmem:[%s3054_s3 + $0x50] sm:$0xff]   ;;  %v81_v20 = vld [vmem:[%s3051_s0 + $0x98] sm:$0xff]  ;;  %v2417_v24 = vld [vmem:[%s3054_s3 + $0x48] sm:$0xff]  }
  0x35   :  { %v2414_v19 = vld [vmem:[%s3054_s3 + $0xd0] sm:$0xff]   ;;  %v103_v23 = vpack.c.bf16 %v81_v20, %v80_v17  ;;  %v2418_v25 = vld [vmem:[%s3054_s3 + $0xc8] sm:$0xff]   ;;  %v2424_v33 = vld [vmem:[%s3054_s3 + $0x80] sm:$0xff]  }
  0x36   :  { %v2415_v21 = vld [vmem:[%s3054_s3 + $0x10] sm:$0xff]   ;;  %v2419_v26 = vld [vmem:[%s3054_s3 + $0x8] sm:$0xff]   ;;  %v86_v38 = vld [vmem:[%s3051_s0 + $0xc0] sm:$0xff] }
  0x37   :  { %337 = vmatpush1.bf16.msra.mxu0 %v2385_v27  ;;  %530 = vmatpush1.bf16.msra.mxu1 %v2386_v28  ;;  %v2416_v22 = vld [vmem:[%s3054_s3 + $0x90] sm:$0xff]   ;;  %v2420_v27 = vld [vmem:[%s3054_s3 + $0x88] sm:$0xff]   ;;  %v82_v28 = vld [vmem:[%s3051_s0 + $0xa0] sm:$0xff] }
  0x38   :  { %338 = vmatprep.subr.bf16.mxu0 %v2387_v29  ;;  %531 = vmatprep.subr.bf16.mxu1 %v2389_v30  ;;  %v83_v29 = vld [vmem:[%s3051_s0 + $0xa8] sm:$0xff]  ;;  %v2421_v30 = vld [vmem:[%s3054_s3 + $0x40] sm:$0xff]   ;;  %v2425_v11 = vld [vmem:[#allocation5 + $0x38] sm:$0xff]  }
  0x39   :  { %v104_v34 = vpack.c.bf16 %v83_v29, %v82_v28  ;;  %v87_v39 = vld [vmem:[%s3051_s0 + $0xc8] sm:$0xff] }
  0x3b   :  { %339 = vmatpush1.bf16.msra.mxu0 %v2391_v31  ;;  %532 = vmatpush1.bf16.msra.mxu1 %v2392_v32  ;;  %v2422_v31 = vld [vmem:[%s3054_s3 + $0xc0] sm:$0xff]  }
  0x3c   :  { %2015 = vmatprep.subr.bf16.mxu0 %v2393_v36  ;;  %2127 = vmatprep.subr.bf16.mxu1 %v2395_v40  ;;  %v2423_v32 = vld [vmem:[%s3054_s3] sm:$0xff]   ;;  %v85_v36 = vld [vmem:[%s3051_s0 + $0xb8] sm:$0xff]  ;;  %v106_v40 = vpack.c.bf16 %v87_v39, %v86_v38 }
  0x3e   :  { %357 = vmatmul.mubr.bf16.vlgmr.msra.gmra.mxu0 %v94_v35  ;;  %550 = vmatmul.mubr.bf16.vlgmr.msra.gmra.mxu1 %v94_v35  ;;  %v84_v35 = vld [vmem:[%s3051_s0 + $0xb0] sm:$0xff] }
  0x3f   :  { %366 = vmatprep.mubr.bf16.mxu0 %v2483_v0  ;;  %559 = vmatprep.mubr.bf16.mxu1 %v2483_v0 }
  0x40   :  { %2016 = vmatpush3.bf16.msra.mxu0 %v2394_v37  ;;  %2128 = vmatpush3.bf16.msra.mxu1 %v2396_v41  ;;  %v105_v37 = vpack.c.bf16 %v85_v36, %v84_v35  ;;  %v88_v41 = vld [vmem:[%s3051_s0 + $0xd0] sm:$0xff] }
  0x41   :  { %2017 = vmatprep.subr.bf16.mxu0 %v2397_v42  ;;  %2129 = vmatprep.subr.bf16.mxu1 %v2399_v44  ;;  %v89_v42 = vld [vmem:[%s3051_s0 + $0xd8] sm:$0xff]  ;;  %v90_v44 = vld [vmem:[%s3051_s0 + $0xe0] sm:$0xff] }
  0x44   :  { %2018 = vmatpush3.bf16.msra.mxu0 %v2398_v43  ;;  %2130 = vmatpush3.bf16.msra.mxu1 %v2400_v46  ;;  %v107_v43 = vpack.c.bf16 %v89_v42, %v88_v41 }
  0x45   :  { %2019 = vmatprep.subr.bf16.mxu0 %v2401_v47  ;;  %2131 = vmatprep.subr.bf16.mxu1 %v2403_v51  ;;  %v92_v47 = vld [vmem:[%s3051_s0 + $0xf0] sm:$0xff]  ;;  %v2766_v51 = vshrl.u32 %v144_v50, 7 }
  0x46   :  { %367 = vmatmul.mubr.bf16.gmra.mxu0 %v95_v45  ;;  %560 = vmatmul.mubr.bf16.gmra.mxu1 %v95_v45  ;;  %v91_v45 = vld [vmem:[%s3051_s0 + $0xe8] sm:$0xff] }
  0x47   :  { %376 = vmatprep.mubr.bf16.mxu0 %v2483_v0  ;;  %569 = vmatprep.mubr.bf16.mxu1 %v2483_v0  ;;  %v108_v46 = vpack.c.bf16 %v91_v45, %v90_v44 }
  0x48   :  { %2020 = vmatpush3.bf16.msra.mxu0 %v2402_v48  ;;  %2132 = vmatpush3.bf16.msra.mxu1 %v2404_v52  ;;  %v93_v48 = vld [vmem:[%s3051_s0 + $0xf8] sm:$0xff]  ;;  %v150_v52 = vsub.s32 1, %v2766_v51 }
  0x49   :  { %2021 = vmatprep.subr.bf16.mxu0 %v2405_v53  ;;  %2133 = vmatprep.subr.bf16.mxu1 %v2406_v54  ;;  %v109_v49 = vpack.c.bf16 %v93_v48, %v92_v47  ;;  %v158_v53 = vsub.s32 3, %v2766_v51  ;;  %v154_v54 = vsub.s32 2, %v2766_v51 }
  0x4c   :  { %2022 = vmatpush3.bf16.msra.mxu0 %v2407_v55  ;;  %2134 = vmatpush3.bf16.msra.mxu1 %v2408_v57  ;;  %v142_v55 = vld [vmem:[%s3053_s2] sm:$0xf] }
  0x4d   :  { %2023 = vmatprep.subr.bf16.mxu0 %v2409_v58  ;;  %2135 = vmatprep.subr.bf16.mxu1 %v2410_v59  ;;  %v2775_v58 = vrot.slane %v142_v55, %v150_v52  ;;  %v2777_v59 = vrot.slane %v142_v55, %v158_v53 }
  0x4e   :  { %377 = vmatmul.mubr.bf16.gmra.mxu0 %v96_v56  ;;  %570 = vmatmul.mubr.bf16.gmra.mxu1 %v96_v56 }
  0x4f   :  { %386 = vmatprep.mubr.bf16.mxu0 %v2483_v0  ;;  %579 = vmatprep.mubr.bf16.mxu1 %v2483_v0 }
  0x50   :  { %2024 = vmatpush3.bf16.msra.mxu0 %v2411_v61  ;;  %2136 = vmatpush3.bf16.msra.mxu1 %v2412_v62  ;;  %v2781_v61 = vrot.slane %v142_v55, %v154_v54 }
  0x51   :  { %2025 = vmatprep.subr.bf16.mxu0 %v2413_v18  ;;  %2137 = vmatprep.subr.bf16.mxu1 %v2414_v19 }
  0x54   :  { %2026 = vmatpush3.bf16.msra.mxu0 %v2415_v21  ;;  %2138 = vmatpush3.bf16.msra.mxu1 %v2416_v22 }
  0x55   :  { %2027 = vmatprep.subr.bf16.mxu0 %v2417_v24  ;;  %2139 = vmatprep.subr.bf16.mxu1 %v2418_v25 }
  0x56   :  { %387 = vmatmul.mubr.bf16.gmra.mxu0 %v97_v1  ;;  %580 = vmatmul.mubr.bf16.gmra.mxu1 %v97_v1 }
  0x57   :  { %396 = vmatprep.mubr.bf16.mxu0 %v2483_v0  ;;  %589 = vmatprep.mubr.bf16.mxu1 %v2483_v0 }
  0x58   :  { %2028 = vmatpush3.bf16.msra.mxu0 %v2419_v26  ;;  %2140 = vmatpush3.bf16.msra.mxu1 %v2420_v27 }
  0x59   :  { %2029 = vmatprep.subr.bf16.mxu0 %v2421_v30  ;;  %2141 = vmatprep.subr.bf16.mxu1 %v2422_v31 }
  0x5c   :  { %2030 = vmatpush3.bf16.msra.mxu0 %v2423_v32  ;;  %2142 = vmatpush3.bf16.msra.mxu1 %v2424_v33  ;;  %v2426_v33 = vld [vmem:[#allocation5 + $0x30] sm:$0xff]  }
  0x5d   :  { %2281 = vmatprep.subr.bf16.mxu0 %v2425_v11 }
  0x5e   :  { %397 = vmatmul.mubr.bf16.gmra.mxu0 %v98_v4  ;;  %590 = vmatmul.mubr.bf16.gmra.mxu1 %v98_v4 }
  0x5f   :  { %406 = vmatprep.mubr.bf16.mxu0 %v2483_v0  ;;  %599 = vmatprep.mubr.bf16.mxu1 %v2483_v0 }
  0x66   :  { %407 = vmatmul.mubr.bf16.gmra.mxu0 %v99_v7  ;;  %600 = vmatmul.mubr.bf16.gmra.mxu1 %v99_v7 }
  0x67   :  { %416 = vmatprep.mubr.bf16.mxu0 %v2483_v0  ;;  %609 = vmatprep.mubr.bf16.mxu1 %v2483_v0 }
  0x6e   :  { %417 = vmatmul.mubr.bf16.gmra.mxu0 %v100_v10  ;;  %610 = vmatmul.mubr.bf16.gmra.mxu1 %v100_v10 }
  0x6f   :  { %426 = vmatprep.mubr.bf16.mxu0 %v2483_v0  ;;  %619 = vmatprep.mubr.bf16.mxu1 %v2483_v0 }
  0x76   :  { %427 = vmatmul.mubr.bf16.gmra.mxu0 %v101_v13  ;;  %620 = vmatmul.mubr.bf16.gmra.mxu1 %v101_v13 }
  0x77   :  { %436 = vmatprep.mubr.bf16.mxu0 %v2483_v0  ;;  %629 = vmatprep.mubr.bf16.mxu1 %v2483_v0 }
  0x7e   :  { %437 = vmatmul.mubr.bf16.gmra.mxu0 %v102_v16  ;;  %630 = vmatmul.mubr.bf16.gmra.mxu1 %v102_v16 }
  0x7f   :  { %446 = vmatprep.mubr.bf16.mxu0 %v2483_v0  ;;  %639 = vmatprep.mubr.bf16.mxu1 %v2483_v0 }
  0x86   :  { %447 = vmatmul.mubr.bf16.gmra.mxu0 %v103_v23  ;;  %640 = vmatmul.mubr.bf16.gmra.mxu1 %v103_v23 }
  0x87   :  { %456 = vmatprep.mubr.bf16.mxu0 %v2483_v0  ;;  %649 = vmatprep.mubr.bf16.mxu1 %v2483_v0 }
  0x8e   :  { %457 = vmatmul.mubr.bf16.gmra.mxu0 %v104_v34  ;;  %650 = vmatmul.mubr.bf16.gmra.mxu1 %v104_v34 }
  0x8f   :  { %466 = vmatprep.mubr.bf16.mxu0 %v2483_v0  ;;  %659 = vmatprep.mubr.bf16.mxu1 %v2483_v0 }
  0x96   :  { %467 = vmatmul.mubr.bf16.gmra.mxu0 %v105_v37  ;;  %660 = vmatmul.mubr.bf16.gmra.mxu1 %v105_v37 }
  0x97   :  { %476 = vmatprep.mubr.bf16.mxu0 %v2483_v0  ;;  %669 = vmatprep.mubr.bf16.mxu1 %v2483_v0 }
  0x9e   :  { %477 = vmatmul.mubr.bf16.gmra.mxu0 %v106_v40  ;;  %670 = vmatmul.mubr.bf16.gmra.mxu1 %v106_v40 }
  0x9f   :  { %486 = vmatprep.mubr.bf16.mxu0 %v2483_v0  ;;  %679 = vmatprep.mubr.bf16.mxu1 %v2483_v0 }
  0xa6   :  { %487 = vmatmul.mubr.bf16.gmra.mxu0 %v107_v43  ;;  %680 = vmatmul.mubr.bf16.gmra.mxu1 %v107_v43 }
  0xa7   :  { %496 = vmatprep.mubr.bf16.mxu0 %v2483_v0  ;;  %689 = vmatprep.mubr.bf16.mxu1 %v2483_v0 }
  0xae   :  { %497 = vmatmul.mubr.bf16.gmra.mxu0 %v108_v46  ;;  %690 = vmatmul.mubr.bf16.gmra.mxu1 %v108_v46 }
  0xaf   :  { %506 = vmatprep.mubr.bf16.mxu0 %v2483_v0  ;;  %699 = vmatprep.mubr.bf16.mxu1 %v2483_v0  ;;  %v146_v0 = vsub.s32 0, %v2766_v51 }
  0xb1   :  { %v2779_v60 = vrot.slane %v142_v55, %v146_v0 }
  0xb6   :  { %507 = vmatmul.mubr.bf16.gmra.mxu0 %v109_v49  ;;  %700 = vmatmul.mubr.bf16.gmra.mxu1 %v109_v49 }
  0xfe   :  { %v358_v56 = vpop.f32.mrf.mxu0  ;;  %v551_v57 = vpop.f32.mrf.mxu1 }
  0xff   :  { %v359_v7 = vadd.f32 %v358_v56, %v2779_v60  ;;  %v552_v8 = vadd.f32 %v551_v57, %v2781_v61 }
 0x100   :  { %v360_v62 = vpop.f32.mrf.mxu0  ;;  %v553_v63 = vpop.f32.mrf.mxu1 }
 0x101   :  { %v361_v3 = vadd.f32 %v360_v62, %v2775_v58  ;;  %v554_v4 = vadd.f32 %v553_v63, %v2777_v59  ;;  %v710_v22 = vmax.f32 %v359_v7, 0.0  ;;  %v712_v23 = vmax.f32 %v552_v8, 0.0 }
 0x102   :  { %v362_v1 = vpop.f32.mrf.mxu0  ;;  %v555_v2 = vpop.f32.mrf.mxu1 }
 0x103   :  { %v363_v5 = vadd.f32 %v362_v1, %v2779_v60  ;;  %v556_v6 = vadd.f32 %v555_v2, %v2781_v61  ;;  %v711_v18 = vmax.f32 %v361_v3, 0.0  ;;  %v713_v19 = vmax.f32 %v554_v4, 0.0 }
 0x104   :  { %v364_v9 = vpop.f32.mrf.mxu0  ;;  %v557_v10 = vpop.f32.mrf.mxu1 }
 0x105   :  { %v365_v12 = vadd.f32 %v364_v9, %v2775_v58  ;;  %v558_v13 = vadd.f32 %v557_v10, %v2777_v59  ;;  %v714_v14 = vmax.f32 %v363_v5, 0.0  ;;  %v716_v15 = vmax.f32 %v556_v6, 0.0 }
 0x106   :  { %v368_v16 = vpop.f32.mrf.mxu0  ;;  %v561_v17 = vpop.f32.mrf.mxu1 }
 0x107   :  { %v715_v20 = vmax.f32 %v365_v12, 0.0  ;;  %v717_v21 = vmax.f32 %v558_v13, 0.0  ;;  %v838_v28 = vpack.c.bf16 %v714_v14, %v710_v22  ;;  %v840_v29 = vpack.c.bf16 %v716_v15, %v712_v23 }
 0x108   :  { %v370_v24 = vpop.f32.mrf.mxu0  ;;  %v563_v25 = vpop.f32.mrf.mxu1  ;;  %v369_v37 = vadd.f32 %v368_v16, %v2779_v60  ;;  %v562_v38 = vadd.f32 %v561_v17, %v2781_v61 }
 0x109   :  { %v839_v26 = vpack.c.bf16 %v715_v20, %v711_v18  ;;  %v841_v27 = vpack.c.bf16 %v717_v21, %v713_v19  ;;  %v371_v30 = vadd.f32 %v370_v24, %v2775_v58  ;;  %v564_v34 = vadd.f32 %v563_v25, %v2777_v59 }
 0x10a   :  { %v372_v31 = vpop.f32.mrf.mxu0  ;;  %v565_v32 = vpop.f32.mrf.mxu1  ;;  %v718_v53 = vmax.f32 %v369_v37, 0.0  ;;  %v720_v0 = vmax.f32 %v562_v38, 0.0 }
 0x10b   :  { %v373_v35 = vadd.f32 %v372_v31, %v2779_v60  ;;  %v566_v36 = vadd.f32 %v565_v32, %v2781_v61  ;;  %1197 = vmatprep.mubr.bf16.mxu0 %v839_v26  ;;  %1358 = vmatprep.mubr.bf16.mxu1 %v841_v27  ;;  %v719_v47 = vmax.f32 %v371_v30, 0.0  ;;  %v721_v48 = vmax.f32 %v564_v34, 0.0 }
 0x10c   :  { %v374_v39 = vpop.f32.mrf.mxu0  ;;  %v567_v40 = vpop.f32.mrf.mxu1  ;;  %1198 = vmatmul.mubr.bf16.vlgmr.msra.gmra.mxu0 %v838_v28  ;;  %1359 = vmatmul.mubr.bf16.vlgmr.msra.gmra.mxu1 %v840_v29 }
 0x10d   :  { %v375_v41 = vadd.f32 %v374_v39, %v2775_v58  ;;  %v568_v42 = vadd.f32 %v567_v40, %v2777_v59  ;;  %2282 = vmatpush3.bf16.msra.mxu0 %v2425_v11  ;;  %v722_v43 = vmax.f32 %v373_v35, 0.0  ;;  %v724_v44 = vmax.f32 %v566_v36, 0.0 }
 0x10e   :  { %v378_v45 = vpop.f32.mrf.mxu0  ;;  %v571_v46 = vpop.f32.mrf.mxu1  ;;  %2283 = vmatprep.subr.bf16.mxu0 %v2426_v33 }
 0x10f   :  { %v723_v49 = vmax.f32 %v375_v41, 0.0  ;;  %v725_v52 = vmax.f32 %v568_v42, 0.0  ;;  %v842_v62 = vpack.c.bf16 %v722_v43, %v718_v53  ;;  %v844_v63 = vpack.c.bf16 %v724_v44, %v720_v0 }
 0x110   :  { %v380_v54 = vpop.f32.mrf.mxu0  ;;  %v573_v55 = vpop.f32.mrf.mxu1  ;;  %v379_v7 = vadd.f32 %v378_v45, %v2779_v60  ;;  %v572_v8 = vadd.f32 %v571_v46, %v2781_v61 }
 0x111   :  { %v843_v56 = vpack.c.bf16 %v723_v49, %v719_v47  ;;  %v845_v57 = vpack.c.bf16 %v725_v52, %v721_v48  ;;  %2284 = vmatpush3.bf16.msra.mxu0 %v2426_v33  ;;  %v381_v1 = vadd.f32 %v380_v54, %v2775_v58  ;;  %v574_v4 = vadd.f32 %v573_v55, %v2777_v59 }
 0x112   :  { %v382_v2 = vpop.f32.mrf.mxu0  ;;  %v575_v3 = vpop.f32.mrf.mxu1  ;;  %v726_v21 = vmax.f32 %v379_v7, 0.0  ;;  %v728_v22 = vmax.f32 %v572_v8, 0.0 }
 0x113   :  { %v383_v5 = vadd.f32 %v382_v2, %v2779_v60  ;;  %v576_v6 = vadd.f32 %v575_v3, %v2781_v61  ;;  %1205 = vmatprep.mubr.bf16.mxu0 %v843_v56  ;;  %1366 = vmatprep.mubr.bf16.mxu1 %v845_v57  ;;  %v727_v17 = vmax.f32 %v381_v1, 0.0  ;;  %v729_v18 = vmax.f32 %v574_v4, 0.0 }
 0x114   :  { %v384_v9 = vpop.f32.mrf.mxu0  ;;  %v577_v10 = vpop.f32.mrf.mxu1  ;;  %1206 = vmatmul.mubr.bf16.gmra.mxu0 %v842_v62  ;;  %1367 = vmatmul.mubr.bf16.gmra.mxu1 %v844_v63 }
 0x115   :  { %v385_v11 = vadd.f32 %v384_v9, %v2775_v58  ;;  %v578_v12 = vadd.f32 %v577_v10, %v2777_v59  ;;  %v730_v13 = vmax.f32 %v383_v5, 0.0  ;;  %v732_v14 = vmax.f32 %v576_v6, 0.0 }
 0x116   :  { %v388_v15 = vpop.f32.mrf.mxu0  ;;  %v581_v16 = vpop.f32.mrf.mxu1 }
 0x117   :  { %v731_v19 = vmax.f32 %v385_v11, 0.0  ;;  %v733_v20 = vmax.f32 %v578_v12, 0.0  ;;  %v846_v27 = vpack.c.bf16 %v730_v13, %v726_v21  ;;  %v848_v28 = vpack.c.bf16 %v732_v14, %v728_v22 }
 0x118   :  { %v390_v23 = vpop.f32.mrf.mxu0  ;;  %v583_v24 = vpop.f32.mrf.mxu1  ;;  %v389_v35 = vadd.f32 %v388_v15, %v2779_v60  ;;  %v582_v36 = vadd.f32 %v581_v16, %v2781_v61 }
 0x119   :  { %v847_v25 = vpack.c.bf16 %v731_v19, %v727_v17  ;;  %v849_v26 = vpack.c.bf16 %v733_v20, %v729_v18  ;;  %v391_v29 = vadd.f32 %v390_v23, %v2775_v58  ;;  %v584_v32 = vadd.f32 %v583_v24, %v2777_v59 }
 0x11a   :  { %v392_v30 = vpop.f32.mrf.mxu0  ;;  %v585_v31 = vpop.f32.mrf.mxu1  ;;  %v734_v49 = vmax.f32 %v389_v35, 0.0  ;;  %v736_v52 = vmax.f32 %v582_v36, 0.0 }
 0x11b   :  { %v393_v33 = vadd.f32 %v392_v30, %v2779_v60  ;;  %v586_v34 = vadd.f32 %v585_v31, %v2781_v61  ;;  %1213 = vmatprep.mubr.bf16.mxu0 %v847_v25  ;;  %1374 = vmatprep.mubr.bf16.mxu1 %v849_v26  ;;  %v735_v45 = vmax.f32 %v391_v29, 0.0  ;;  %v737_v46 = vmax.f32 %v584_v32, 0.0 }
 0x11c   :  { %v394_v37 = vpop.f32.mrf.mxu0  ;;  %v587_v38 = vpop.f32.mrf.mxu1  ;;  %1214 = vmatmul.mubr.bf16.gmra.mxu0 %v846_v27  ;;  %1375 = vmatmul.mubr.bf16.gmra.mxu1 %v848_v28 }
 0x11d   :  { %v395_v39 = vadd.f32 %v394_v37, %v2775_v58  ;;  %v588_v40 = vadd.f32 %v587_v38, %v2777_v59  ;;  %v738_v41 = vmax.f32 %v393_v33, 0.0  ;;  %v740_v42 = vmax.f32 %v586_v34, 0.0 }
 0x11e   :  { %v398_v43 = vpop.f32.mrf.mxu0  ;;  %v591_v44 = vpop.f32.mrf.mxu1 }
 0x11f   :  { %v739_v47 = vmax.f32 %v395_v39, 0.0  ;;  %v741_v48 = vmax.f32 %v588_v40, 0.0  ;;  %v850_v56 = vpack.c.bf16 %v738_v41, %v734_v49  ;;  %v852_v57 = vpack.c.bf16 %v740_v42, %v736_v52 }
 0x120   :  { %v400_v53 = vpop.f32.mrf.mxu0  ;;  %v593_v0 = vpop.f32.mrf.mxu1  ;;  %v399_v5 = vadd.f32 %v398_v43, %v2779_v60  ;;  %v592_v6 = vadd.f32 %v591_v44, %v2781_v61 }
 0x121   :  { %v851_v54 = vpack.c.bf16 %v739_v47, %v735_v45  ;;  %v853_v55 = vpack.c.bf16 %v741_v48, %v737_v46  ;;  %v401_v62 = vadd.f32 %v400_v53, %v2775_v58  ;;  %v594_v2 = vadd.f32 %v593_v0, %v2777_v59 }
 0x122   :  { %v402_v63 = vpop.f32.mrf.mxu0  ;;  %v595_v1 = vpop.f32.mrf.mxu1  ;;  %v742_v19 = vmax.f32 %v399_v5, 0.0  ;;  %v744_v20 = vmax.f32 %v592_v6, 0.0 }
 0x123   :  { %v403_v3 = vadd.f32 %v402_v63, %v2779_v60  ;;  %v596_v4 = vadd.f32 %v595_v1, %v2781_v61  ;;  %1221 = vmatprep.mubr.bf16.mxu0 %v851_v54  ;;  %1382 = vmatprep.mubr.bf16.mxu1 %v853_v55  ;;  %v743_v15 = vmax.f32 %v401_v62, 0.0  ;;  %v745_v16 = vmax.f32 %v594_v2, 0.0 }
 0x124   :  { %v404_v7 = vpop.f32.mrf.mxu0  ;;  %v597_v8 = vpop.f32.mrf.mxu1  ;;  %1222 = vmatmul.mubr.bf16.gmra.mxu0 %v850_v56  ;;  %1383 = vmatmul.mubr.bf16.gmra.mxu1 %v852_v57 }
 0x125   :  { %v405_v9 = vadd.f32 %v404_v7, %v2775_v58  ;;  %v598_v10 = vadd.f32 %v597_v8, %v2777_v59  ;;  %v746_v11 = vmax.f32 %v403_v3, 0.0  ;;  %v748_v12 = vmax.f32 %v596_v4, 0.0 }
 0x126   :  { %v408_v13 = vpop.f32.mrf.mxu0  ;;  %v601_v14 = vpop.f32.mrf.mxu1 }
 0x127   :  { %v747_v17 = vmax.f32 %v405_v9, 0.0  ;;  %v749_v18 = vmax.f32 %v598_v10, 0.0  ;;  %v854_v25 = vpack.c.bf16 %v746_v11, %v742_v19  ;;  %v856_v26 = vpack.c.bf16 %v748_v12, %v744_v20 }
 0x128   :  { %v410_v21 = vpop.f32.mrf.mxu0  ;;  %v603_v22 = vpop.f32.mrf.mxu1  ;;  %v409_v33 = vadd.f32 %v408_v13, %v2779_v60  ;;  %v602_v34 = vadd.f32 %v601_v14, %v2781_v61 }
 0x129   :  { %v855_v23 = vpack.c.bf16 %v747_v17, %v743_v15  ;;  %v857_v24 = vpack.c.bf16 %v749_v18, %v745_v16  ;;  %v411_v27 = vadd.f32 %v410_v21, %v2775_v58  ;;  %v604_v30 = vadd.f32 %v603_v22, %v2777_v59 }
 0x12a   :  { %v412_v28 = vpop.f32.mrf.mxu0  ;;  %v605_v29 = vpop.f32.mrf.mxu1  ;;  %v750_v47 = vmax.f32 %v409_v33, 0.0  ;;  %v752_v48 = vmax.f32 %v602_v34, 0.0 }
 0x12b   :  { %v413_v31 = vadd.f32 %v412_v28, %v2779_v60  ;;  %v606_v32 = vadd.f32 %v605_v29, %v2781_v61  ;;  %1229 = vmatprep.mubr.bf16.mxu0 %v855_v23  ;;  %1390 = vmatprep.mubr.bf16.mxu1 %v857_v24  ;;  %v751_v43 = vmax.f32 %v411_v27, 0.0  ;;  %v753_v44 = vmax.f32 %v604_v30, 0.0 }
 0x12c   :  { %v414_v35 = vpop.f32.mrf.mxu0  ;;  %v607_v36 = vpop.f32.mrf.mxu1  ;;  %1230 = vmatmul.mubr.bf16.gmra.mxu0 %v854_v25  ;;  %1391 = vmatmul.mubr.bf16.gmra.mxu1 %v856_v26 }
 0x12d   :  { %v415_v37 = vadd.f32 %v414_v35, %v2775_v58  ;;  %v608_v38 = vadd.f32 %v607_v36, %v2777_v59  ;;  %v754_v39 = vmax.f32 %v413_v31, 0.0  ;;  %v756_v40 = vmax.f32 %v606_v32, 0.0 }
 0x12e   :  { %v418_v41 = vpop.f32.mrf.mxu0  ;;  %v611_v42 = vpop.f32.mrf.mxu1 }
 0x12f   :  { %v755_v45 = vmax.f32 %v415_v37, 0.0  ;;  %v757_v46 = vmax.f32 %v608_v38, 0.0  ;;  %v858_v54 = vpack.c.bf16 %v754_v39, %v750_v47  ;;  %v860_v55 = vpack.c.bf16 %v756_v40, %v752_v48 }
 0x130   :  { %v420_v49 = vpop.f32.mrf.mxu0  ;;  %v613_v52 = vpop.f32.mrf.mxu1  ;;  %v419_v3 = vadd.f32 %v418_v41, %v2779_v60  ;;  %v612_v4 = vadd.f32 %v611_v42, %v2781_v61 }
 0x131   :  { %v861_v53 = vpack.c.bf16 %v757_v46, %v753_v44  ;;  %v859_v0 = vpack.c.bf16 %v755_v45, %v751_v43  ;;  %v421_v56 = vadd.f32 %v420_v49, %v2775_v58  ;;  %v614_v63 = vadd.f32 %v613_v52, %v2777_v59 }
 0x132   :  { %v422_v57 = vpop.f32.mrf.mxu0  ;;  %v615_v62 = vpop.f32.mrf.mxu1  ;;  %v758_v17 = vmax.f32 %v419_v3, 0.0  ;;  %v760_v18 = vmax.f32 %v612_v4, 0.0 }
 0x133   :  { %v423_v1 = vadd.f32 %v422_v57, %v2779_v60  ;;  %v616_v2 = vadd.f32 %v615_v62, %v2781_v61  ;;  %1237 = vmatprep.mubr.bf16.mxu0 %v859_v0  ;;  %1398 = vmatprep.mubr.bf16.mxu1 %v861_v53  ;;  %v759_v13 = vmax.f32 %v421_v56, 0.0  ;;  %v761_v14 = vmax.f32 %v614_v63, 0.0 }
 0x134   :  { %v424_v5 = vpop.f32.mrf.mxu0  ;;  %v617_v6 = vpop.f32.mrf.mxu1  ;;  %1238 = vmatmul.mubr.bf16.gmra.mxu0 %v858_v54  ;;  %1399 = vmatmul.mubr.bf16.gmra.mxu1 %v860_v55 }
 0x135   :  { %v425_v7 = vadd.f32 %v424_v5, %v2775_v58  ;;  %v618_v8 = vadd.f32 %v617_v6, %v2777_v59  ;;  %v762_v9 = vmax.f32 %v423_v1, 0.0  ;;  %v764_v10 = vmax.f32 %v616_v2, 0.0 }
 0x136   :  { %v428_v11 = vpop.f32.mrf.mxu0  ;;  %v621_v12 = vpop.f32.mrf.mxu1 }
 0x137   :  { %v763_v15 = vmax.f32 %v425_v7, 0.0  ;;  %v765_v16 = vmax.f32 %v618_v8, 0.0  ;;  %v862_v23 = vpack.c.bf16 %v762_v9, %v758_v17  ;;  %v864_v24 = vpack.c.bf16 %v764_v10, %v760_v18 }
 0x138   :  { %v430_v19 = vpop.f32.mrf.mxu0  ;;  %v623_v20 = vpop.f32.mrf.mxu1  ;;  %v429_v31 = vadd.f32 %v428_v11, %v2779_v60  ;;  %v622_v32 = vadd.f32 %v621_v12, %v2781_v61 }
 0x139   :  { %v865_v21 = vpack.c.bf16 %v765_v16, %v761_v14  ;;  %v863_v22 = vpack.c.bf16 %v763_v15, %v759_v13  ;;  %v431_v25 = vadd.f32 %v430_v19, %v2775_v58  ;;  %v624_v28 = vadd.f32 %v623_v20, %v2777_v59 }
 0x13a   :  { %v432_v26 = vpop.f32.mrf.mxu0  ;;  %v625_v27 = vpop.f32.mrf.mxu1  ;;  %v766_v45 = vmax.f32 %v429_v31, 0.0  ;;  %v768_v46 = vmax.f32 %v622_v32, 0.0 }
 0x13b   :  { %v433_v29 = vadd.f32 %v432_v26, %v2779_v60  ;;  %v626_v30 = vadd.f32 %v625_v27, %v2781_v61  ;;  %1245 = vmatprep.mubr.bf16.mxu0 %v863_v22  ;;  %1406 = vmatprep.mubr.bf16.mxu1 %v865_v21  ;;  %v767_v41 = vmax.f32 %v431_v25, 0.0  ;;  %v769_v42 = vmax.f32 %v624_v28, 0.0 }
 0x13c   :  { %v434_v33 = vpop.f32.mrf.mxu0  ;;  %v627_v34 = vpop.f32.mrf.mxu1  ;;  %1246 = vmatmul.mubr.bf16.gmra.mxu0 %v862_v23  ;;  %1407 = vmatmul.mubr.bf16.gmra.mxu1 %v864_v24 }
 0x13d   :  { %v435_v35 = vadd.f32 %v434_v33, %v2775_v58  ;;  %v628_v36 = vadd.f32 %v627_v34, %v2777_v59  ;;  %v770_v37 = vmax.f32 %v433_v29, 0.0  ;;  %v772_v38 = vmax.f32 %v626_v30, 0.0  ;;  %v2427_v33 = vld [vmem:[#allocation5 + $0x28] sm:$0xff]  }
 0x13e   :  { %v438_v39 = vpop.f32.mrf.mxu0  ;;  %v631_v40 = vpop.f32.mrf.mxu1  ;;  %2285 = vmatprep.subr.bf16.mxu0 %v2427_v33 }
 0x13f   :  { %v771_v43 = vmax.f32 %v435_v35, 0.0  ;;  %v773_v44 = vmax.f32 %v628_v36, 0.0  ;;  %v866_v53 = vpack.c.bf16 %v770_v37, %v766_v45  ;;  %v868_v0 = vpack.c.bf16 %v772_v38, %v768_v46  ;;  %2286 = vmatpush3.bf16.msra.mxu0 %v2427_v33 }
 0x140   :  { %v440_v47 = vpop.f32.mrf.mxu0  ;;  %v633_v48 = vpop.f32.mrf.mxu1  ;;  %v439_v1 = vadd.f32 %v438_v39, %v2779_v60  ;;  %v632_v2 = vadd.f32 %v631_v40, %v2781_v61 }
 0x141   :  { %v869_v49 = vpack.c.bf16 %v773_v44, %v769_v42  ;;  %v867_v52 = vpack.c.bf16 %v771_v43, %v767_v41  ;;  %v441_v54 = vadd.f32 %v440_v47, %v2775_v58  ;;  %v634_v57 = vadd.f32 %v633_v48, %v2777_v59  ;;  %v2428_v48 = vld [vmem:[#allocation5 + $0x20] sm:$0xff]  }
 0x142   :  { %v442_v55 = vpop.f32.mrf.mxu0  ;;  %v635_v56 = vpop.f32.mrf.mxu1  ;;  %v774_v15 = vmax.f32 %v439_v1, 0.0  ;;  %v776_v16 = vmax.f32 %v632_v2, 0.0  ;;  %2287 = vmatprep.subr.bf16.mxu0 %v2428_v48 }
 0x143   :  { %v443_v62 = vadd.f32 %v442_v55, %v2779_v60  ;;  %v636_v63 = vadd.f32 %v635_v56, %v2781_v61  ;;  %1253 = vmatprep.mubr.bf16.mxu0 %v867_v52  ;;  %1414 = vmatprep.mubr.bf16.mxu1 %v869_v49  ;;  %v775_v11 = vmax.f32 %v441_v54, 0.0  ;;  %v777_v12 = vmax.f32 %v634_v57, 0.0 }
 0x144   :  { %v444_v3 = vpop.f32.mrf.mxu0  ;;  %v637_v4 = vpop.f32.mrf.mxu1  ;;  %1254 = vmatmul.mubr.bf16.gmra.mxu0 %v866_v53  ;;  %1415 = vmatmul.mubr.bf16.gmra.mxu1 %v868_v0 }
 0x145   :  { %v445_v5 = vadd.f32 %v444_v3, %v2775_v58  ;;  %v638_v6 = vadd.f32 %v637_v4, %v2777_v59  ;;  %v778_v7 = vmax.f32 %v443_v62, 0.0  ;;  %v780_v8 = vmax.f32 %v636_v63, 0.0  ;;  %2288 = vmatpush3.bf16.msra.mxu0 %v2428_v48 }
 0x146   :  { %v448_v9 = vpop.f32.mrf.mxu0  ;;  %v641_v10 = vpop.f32.mrf.mxu1 }
 0x147   :  { %v779_v13 = vmax.f32 %v445_v5, 0.0  ;;  %v781_v14 = vmax.f32 %v638_v6, 0.0  ;;  %v870_v21 = vpack.c.bf16 %v778_v7, %v774_v15  ;;  %v872_v22 = vpack.c.bf16 %v780_v8, %v776_v16  ;;  %v2429_v5 = vld [vmem:[#allocation5 + $0x18] sm:$0xff]  }
 0x148   :  { %v450_v17 = vpop.f32.mrf.mxu0  ;;  %v643_v18 = vpop.f32.mrf.mxu1  ;;  %v449_v29 = vadd.f32 %v448_v9, %v2779_v60  ;;  %v642_v30 = vadd.f32 %v641_v10, %v2781_v61  ;;  %2289 = vmatprep.subr.bf16.mxu0 %v2429_v5 }
 0x149   :  { %v873_v19 = vpack.c.bf16 %v781_v14, %v777_v12  ;;  %v871_v20 = vpack.c.bf16 %v779_v13, %v775_v11  ;;  %v451_v23 = vadd.f32 %v450_v17, %v2775_v58  ;;  %v644_v26 = vadd.f32 %v643_v18, %v2777_v59  ;;  %2290 = vmatpush3.bf16.msra.mxu0 %v2429_v5 }
 0x14a   :  { %v452_v24 = vpop.f32.mrf.mxu0  ;;  %v645_v25 = vpop.f32.mrf.mxu1  ;;  %v782_v44 = vmax.f32 %v449_v29, 0.0  ;;  %v784_v45 = vmax.f32 %v642_v30, 0.0 }
 0x14b   :  { %v453_v27 = vadd.f32 %v452_v24, %v2779_v60  ;;  %v646_v28 = vadd.f32 %v645_v25, %v2781_v61  ;;  %1261 = vmatprep.mubr.bf16.mxu0 %v871_v20  ;;  %1422 = vmatprep.mubr.bf16.mxu1 %v873_v19  ;;  %v783_v40 = vmax.f32 %v451_v23, 0.0  ;;  %v785_v41 = vmax.f32 %v644_v26, 0.0  ;;  %v2430_v20 = vld [vmem:[#allocation5 + $0x10] sm:$0xff]  }
 0x14c   :  { %v454_v31 = vpop.f32.mrf.mxu0  ;;  %v647_v32 = vpop.f32.mrf.mxu1  ;;  %1262 = vmatmul.mubr.bf16.gmra.mxu0 %v870_v21  ;;  %1423 = vmatmul.mubr.bf16.gmra.mxu1 %v872_v22 }
 0x14d   :  { %v455_v34 = vadd.f32 %v454_v31, %v2775_v58  ;;  %v648_v35 = vadd.f32 %v647_v32, %v2777_v59  ;;  %v786_v36 = vmax.f32 %v453_v27, 0.0  ;;  %v788_v37 = vmax.f32 %v646_v28, 0.0  ;;  %2291 = vmatprep.subr.bf16.mxu0 %v2430_v20 }
 0x14e   :  { %v458_v38 = vpop.f32.mrf.mxu0  ;;  %v651_v39 = vpop.f32.mrf.mxu1  ;;  %2292 = vmatpush3.bf16.msra.mxu0 %v2430_v20 }
 0x14f   :  { %v787_v42 = vmax.f32 %v455_v34, 0.0  ;;  %v789_v43 = vmax.f32 %v648_v35, 0.0  ;;  %v874_v53 = vpack.c.bf16 %v786_v36, %v782_v44  ;;  %v876_v0 = vpack.c.bf16 %v788_v37, %v784_v45  ;;  %v2431_v35 = vld [vmem:[#allocation5 + $0x8] sm:$0xff]  }
 0x150   :  { %v460_v46 = vpop.f32.mrf.mxu0  ;;  %v653_v47 = vpop.f32.mrf.mxu1  ;;  %v459_v1 = vadd.f32 %v458_v38, %v2779_v60  ;;  %v652_v2 = vadd.f32 %v651_v39, %v2781_v61  ;;  %2293 = vmatprep.subr.bf16.mxu0 %v2431_v35 }
 0x151   :  { %v877_v49 = vpack.c.bf16 %v789_v43, %v785_v41  ;;  %v875_v52 = vpack.c.bf16 %v787_v42, %v783_v40  ;;  %v461_v54 = vadd.f32 %v460_v46, %v2775_v58  ;;  %v654_v57 = vadd.f32 %v653_v47, %v2777_v59 }
 0x152   :  { %v462_v55 = vpop.f32.mrf.mxu0  ;;  %v655_v56 = vpop.f32.mrf.mxu1  ;;  %v790_v16 = vmax.f32 %v459_v1, 0.0  ;;  %v792_v17 = vmax.f32 %v652_v2, 0.0  ;;  %2294 = vmatpush3.bf16.msra.mxu0 %v2431_v35 }
 0x153   :  { %v463_v62 = vadd.f32 %v462_v55, %v2779_v60  ;;  %v656_v63 = vadd.f32 %v655_v56, %v2781_v61  ;;  %1269 = vmatprep.mubr.bf16.mxu0 %v875_v52  ;;  %1430 = vmatprep.mubr.bf16.mxu1 %v877_v49  ;;  %v791_v12 = vmax.f32 %v461_v54, 0.0  ;;  %v793_v13 = vmax.f32 %v654_v57, 0.0  ;;  %v2432_v52 = vld [vmem:[#allocation5] sm:$0xff]  }
 0x154   :  { %v464_v3 = vpop.f32.mrf.mxu0  ;;  %v657_v4 = vpop.f32.mrf.mxu1  ;;  %1270 = vmatmul.mubr.bf16.gmra.mxu0 %v874_v53  ;;  %1431 = vmatmul.mubr.bf16.gmra.mxu1 %v876_v0 }
 0x155   :  { %v465_v6 = vadd.f32 %v464_v3, %v2775_v58  ;;  %v658_v7 = vadd.f32 %v657_v4, %v2777_v59  ;;  %v794_v8 = vmax.f32 %v463_v62, 0.0  ;;  %v796_v9 = vmax.f32 %v656_v63, 0.0  ;;  %2295 = vmatprep.subr.bf16.mxu0 %v2432_v52 }
 0x156   :  { %v468_v10 = vpop.f32.mrf.mxu0  ;;  %v661_v11 = vpop.f32.mrf.mxu1  ;;  %2296 = vmatpush3.bf16.msra.mxu0 %v2432_v52 }
 0x157   :  { %v795_v14 = vmax.f32 %v465_v6, 0.0  ;;  %v797_v15 = vmax.f32 %v658_v7, 0.0  ;;  %v878_v23 = vpack.c.bf16 %v794_v8, %v790_v16  ;;  %v880_v24 = vpack.c.bf16 %v796_v9, %v792_v17 }
 0x158   :  { %v470_v18 = vpop.f32.mrf.mxu0  ;;  %v663_v19 = vpop.f32.mrf.mxu1  ;;  %v469_v31 = vadd.f32 %v468_v10, %v2779_v60  ;;  %v662_v32 = vadd.f32 %v661_v11, %v2781_v61 }
 0x159   :  { %v881_v21 = vpack.c.bf16 %v797_v15, %v793_v13  ;;  %v879_v22 = vpack.c.bf16 %v795_v14, %v791_v12  ;;  %v471_v25 = vadd.f32 %v470_v18, %v2775_v58  ;;  %v664_v28 = vadd.f32 %v663_v19, %v2777_v59 }
 0x15a   :  { %v472_v26 = vpop.f32.mrf.mxu0  ;;  %v665_v27 = vpop.f32.mrf.mxu1  ;;  %v798_v46 = vmax.f32 %v469_v31, 0.0  ;;  %v800_v47 = vmax.f32 %v662_v32, 0.0 }
 0x15b   :  { %v473_v29 = vadd.f32 %v472_v26, %v2779_v60  ;;  %v666_v30 = vadd.f32 %v665_v27, %v2781_v61  ;;  %1277 = vmatprep.mubr.bf16.mxu0 %v879_v22  ;;  %1438 = vmatprep.mubr.bf16.mxu1 %v881_v21  ;;  %v799_v42 = vmax.f32 %v471_v25, 0.0  ;;  %v801_v43 = vmax.f32 %v664_v28, 0.0 }
 0x15c   :  { %v474_v33 = vpop.f32.mrf.mxu0  ;;  %v667_v34 = vpop.f32.mrf.mxu1  ;;  %1278 = vmatmul.mubr.bf16.gmra.mxu0 %v878_v23  ;;  %1439 = vmatmul.mubr.bf16.gmra.mxu1 %v880_v24 }
 0x15d   :  { %v475_v36 = vadd.f32 %v474_v33, %v2775_v58  ;;  %v668_v37 = vadd.f32 %v667_v34, %v2777_v59  ;;  %v802_v38 = vmax.f32 %v473_v29, 0.0  ;;  %v804_v39 = vmax.f32 %v666_v30, 0.0 }
 0x15e   :  { %v478_v40 = vpop.f32.mrf.mxu0  ;;  %v671_v41 = vpop.f32.mrf.mxu1 }
 0x15f   :  { %v803_v44 = vmax.f32 %v475_v36, 0.0  ;;  %v805_v45 = vmax.f32 %v668_v37, 0.0  ;;  %v882_v54 = vpack.c.bf16 %v802_v38, %v798_v46  ;;  %v884_v55 = vpack.c.bf16 %v804_v39, %v800_v47 }
 0x160   :  { %v480_v48 = vpop.f32.mrf.mxu0  ;;  %v673_v49 = vpop.f32.mrf.mxu1  ;;  %v479_v3 = vadd.f32 %v478_v40, %v2779_v60  ;;  %v672_v4 = vadd.f32 %v671_v41, %v2781_v61 }
 0x161   :  { %v885_v53 = vpack.c.bf16 %v805_v45, %v801_v43  ;;  %v883_v0 = vpack.c.bf16 %v803_v44, %v799_v42  ;;  %v481_v56 = vadd.f32 %v480_v48, %v2775_v58  ;;  %v674_v63 = vadd.f32 %v673_v49, %v2777_v59 }
 0x162   :  { %v482_v57 = vpop.f32.mrf.mxu0  ;;  %v675_v62 = vpop.f32.mrf.mxu1  ;;  %v806_v17 = vmax.f32 %v479_v3, 0.0  ;;  %v808_v18 = vmax.f32 %v672_v4, 0.0 }
 0x163   :  { %v483_v1 = vadd.f32 %v482_v57, %v2779_v60  ;;  %v676_v2 = vadd.f32 %v675_v62, %v2781_v61  ;;  %1285 = vmatprep.mubr.bf16.mxu0 %v883_v0  ;;  %1446 = vmatprep.mubr.bf16.mxu1 %v885_v53  ;;  %v807_v13 = vmax.f32 %v481_v56, 0.0  ;;  %v809_v14 = vmax.f32 %v674_v63, 0.0 }
 0x164   :  { %v484_v5 = vpop.f32.mrf.mxu0  ;;  %v677_v6 = vpop.f32.mrf.mxu1  ;;  %1286 = vmatmul.mubr.bf16.gmra.mxu0 %v882_v54  ;;  %1447 = vmatmul.mubr.bf16.gmra.mxu1 %v884_v55 }
 0x165   :  { %v485_v7 = vadd.f32 %v484_v5, %v2775_v58  ;;  %v678_v8 = vadd.f32 %v677_v6, %v2777_v59  ;;  %v810_v9 = vmax.f32 %v483_v1, 0.0  ;;  %v812_v10 = vmax.f32 %v676_v2, 0.0 }
 0x166   :  { %v488_v11 = vpop.f32.mrf.mxu0  ;;  %v681_v12 = vpop.f32.mrf.mxu1 }
 0x167   :  { %v811_v15 = vmax.f32 %v485_v7, 0.0  ;;  %v813_v16 = vmax.f32 %v678_v8, 0.0  ;;  %v886_v23 = vpack.c.bf16 %v810_v9, %v806_v17  ;;  %v888_v24 = vpack.c.bf16 %v812_v10, %v808_v18 }
 0x168   :  { %v490_v19 = vpop.f32.mrf.mxu0  ;;  %v683_v20 = vpop.f32.mrf.mxu1  ;;  %v489_v31 = vadd.f32 %v488_v11, %v2779_v60  ;;  %v682_v32 = vadd.f32 %v681_v12, %v2781_v61 }
 0x169   :  { %v887_v21 = vpack.c.bf16 %v811_v15, %v807_v13  ;;  %v889_v22 = vpack.c.bf16 %v813_v16, %v809_v14  ;;  %v491_v25 = vadd.f32 %v490_v19, %v2775_v58  ;;  %v684_v28 = vadd.f32 %v683_v20, %v2777_v59 }
 0x16a   :  { %v492_v26 = vpop.f32.mrf.mxu0  ;;  %v685_v27 = vpop.f32.mrf.mxu1  ;;  %v814_v45 = vmax.f32 %v489_v31, 0.0  ;;  %v816_v46 = vmax.f32 %v682_v32, 0.0 }
 0x16b   :  { %v493_v29 = vadd.f32 %v492_v26, %v2779_v60  ;;  %v686_v30 = vadd.f32 %v685_v27, %v2781_v61  ;;  %1293 = vmatprep.mubr.bf16.mxu0 %v887_v21  ;;  %1454 = vmatprep.mubr.bf16.mxu1 %v889_v22  ;;  %v815_v41 = vmax.f32 %v491_v25, 0.0  ;;  %v817_v42 = vmax.f32 %v684_v28, 0.0 }
 0x16c   :  { %v494_v33 = vpop.f32.mrf.mxu0  ;;  %v687_v34 = vpop.f32.mrf.mxu1  ;;  %1294 = vmatmul.mubr.bf16.gmra.mxu0 %v886_v23  ;;  %1455 = vmatmul.mubr.bf16.gmra.mxu1 %v888_v24 }
 0x16d   :  { %v495_v35 = vadd.f32 %v494_v33, %v2775_v58  ;;  %v688_v36 = vadd.f32 %v687_v34, %v2777_v59  ;;  %v818_v37 = vmax.f32 %v493_v29, 0.0  ;;  %v820_v38 = vmax.f32 %v686_v30, 0.0 }
 0x16e   :  { %v498_v39 = vpop.f32.mrf.mxu0  ;;  %v691_v40 = vpop.f32.mrf.mxu1 }
 0x16f   :  { %v819_v43 = vmax.f32 %v495_v35, 0.0  ;;  %v821_v44 = vmax.f32 %v688_v36, 0.0  ;;  %v890_v53 = vpack.c.bf16 %v818_v37, %v814_v45  ;;  %v892_v0 = vpack.c.bf16 %v820_v38, %v816_v46 }
 0x170   :  { %v500_v47 = vpop.f32.mrf.mxu0  ;;  %v693_v48 = vpop.f32.mrf.mxu1  ;;  %v499_v1 = vadd.f32 %v498_v39, %v2779_v60  ;;  %v692_v2 = vadd.f32 %v691_v40, %v2781_v61 }
 0x171   :  { %v891_v49 = vpack.c.bf16 %v819_v43, %v815_v41  ;;  %v893_v52 = vpack.c.bf16 %v821_v44, %v817_v42  ;;  %v501_v54 = vadd.f32 %v500_v47, %v2775_v58  ;;  %v694_v57 = vadd.f32 %v693_v48, %v2777_v59 }
 0x172   :  { %v502_v55 = vpop.f32.mrf.mxu0  ;;  %v695_v56 = vpop.f32.mrf.mxu1  ;;  %v822_v15 = vmax.f32 %v499_v1, 0.0  ;;  %v824_v16 = vmax.f32 %v692_v2, 0.0 }
 0x173   :  { %v503_v62 = vadd.f32 %v502_v55, %v2779_v60  ;;  %v696_v63 = vadd.f32 %v695_v56, %v2781_v61  ;;  %1301 = vmatprep.mubr.bf16.mxu0 %v891_v49  ;;  %1462 = vmatprep.mubr.bf16.mxu1 %v893_v52  ;;  %v823_v11 = vmax.f32 %v501_v54, 0.0  ;;  %v825_v12 = vmax.f32 %v694_v57, 0.0 }
 0x174   :  { %v504_v3 = vpop.f32.mrf.mxu0  ;;  %v697_v4 = vpop.f32.mrf.mxu1  ;;  %1302 = vmatmul.mubr.bf16.gmra.mxu0 %v890_v53  ;;  %1463 = vmatmul.mubr.bf16.gmra.mxu1 %v892_v0 }
 0x175   :  { %v505_v5 = vadd.f32 %v504_v3, %v2775_v58  ;;  %v698_v6 = vadd.f32 %v697_v4, %v2777_v59  ;;  %v826_v7 = vmax.f32 %v503_v62, 0.0  ;;  %v828_v8 = vmax.f32 %v696_v63, 0.0 }
 0x176   :  { %v508_v9 = vpop.f32.mrf.mxu0  ;;  %v701_v10 = vpop.f32.mrf.mxu1 }
 0x177   :  { %v827_v13 = vmax.f32 %v505_v5, 0.0  ;;  %v829_v14 = vmax.f32 %v698_v6, 0.0  ;;  %v894_v21 = vpack.c.bf16 %v826_v7, %v822_v15  ;;  %v896_v22 = vpack.c.bf16 %v828_v8, %v824_v16 }
 0x178   :  { %v510_v17 = vpop.f32.mrf.mxu0  ;;  %v703_v18 = vpop.f32.mrf.mxu1  ;;  %v509_v29 = vadd.f32 %v508_v9, %v2779_v60  ;;  %v702_v30 = vadd.f32 %v701_v10, %v2781_v61 }
 0x179   :  { %v895_v19 = vpack.c.bf16 %v827_v13, %v823_v11  ;;  %v897_v20 = vpack.c.bf16 %v829_v14, %v825_v12  ;;  %v511_v23 = vadd.f32 %v510_v17, %v2775_v58  ;;  %v704_v26 = vadd.f32 %v703_v18, %v2777_v59 }
 0x17a   :  { %v512_v24 = vpop.f32.mrf.mxu0  ;;  %v705_v25 = vpop.f32.mrf.mxu1  ;;  %v830_v41 = vmax.f32 %v509_v29, 0.0  ;;  %v832_v42 = vmax.f32 %v702_v30, 0.0 }
 0x17b   :  { %v513_v27 = vadd.f32 %v512_v24, %v2779_v60  ;;  %v706_v28 = vadd.f32 %v705_v25, %v2781_v61  ;;  %1309 = vmatprep.mubr.bf16.mxu0 %v895_v19  ;;  %1470 = vmatprep.mubr.bf16.mxu1 %v897_v20  ;;  %v831_v37 = vmax.f32 %v511_v23, 0.0  ;;  %v833_v38 = vmax.f32 %v704_v26, 0.0 }
 0x17c   :  { %v514_v31 = vpop.f32.mrf.mxu0  ;;  %v707_v32 = vpop.f32.mrf.mxu1  ;;  %1310 = vmatmul.mubr.bf16.gmra.mxu0 %v894_v21  ;;  %1471 = vmatmul.mubr.bf16.gmra.mxu1 %v896_v22 }
 0x17d   :  { %v515_v33 = vadd.f32 %v514_v31, %v2775_v58  ;;  %v708_v34 = vadd.f32 %v707_v32, %v2777_v59  ;;  %v834_v35 = vmax.f32 %v513_v27, 0.0  ;;  %v836_v36 = vmax.f32 %v706_v28, 0.0  ;;  %v2914_v59 = vld [vmem:[%s3055_s4] ss:$0 sm:$0xff] }
 0x17f   :  { %v835_v39 = vmax.f32 %v515_v33, 0.0  ;;  %v837_v40 = vmax.f32 %v708_v34, 0.0  ;;  %v898_v44 = vpack.c.bf16 %v834_v35, %v830_v41  ;;  %v900_v61 = vpack.c.bf16 %v836_v36, %v832_v42 }
 0x181   :  { %v899_v43 = vpack.c.bf16 %v835_v39, %v831_v37  ;;  %v901_v60 = vpack.c.bf16 %v837_v40, %v833_v38 }
 0x183   :  { %1317 = vmatprep.mubr.bf16.mxu0 %v899_v43  ;;  %1478 = vmatprep.mubr.bf16.mxu1 %v901_v60 }
 0x184   :  { %1318 = vmatmul.mubr.bf16.gmra.mxu0 %v898_v44  ;;  %1479 = vmatmul.mubr.bf16.gmra.mxu1 %v900_v61 }
 0x1cc   :  { %v2031_v45 = vpop.f32.mrf.mxu0  ;;  %v2143_v58 = vpop.f32.mrf.mxu1 }
 0x1ce   :  { %v2032_v46 = vpop.f32.mrf.mxu0  ;;  %v2144_v47 = vpop.f32.mrf.mxu1 }
 0x1cf   :  { %v2033_v48 = vadd.f32 %v2032_v46, %v2031_v45  ;;  %v2145_v55 = vadd.f32 %v2144_v47, %v2143_v58 }
 0x1d0   :  { %v2034_v49 = vpop.f32.mrf.mxu0  ;;  %v2146_v52 = vpop.f32.mrf.mxu1 }
 0x1d1   :  { %v1200_v53 = vadd.f32 %v2033_v48, %v2914_v59 }
 0x1d2   :  { %v2035_v0 = vpop.f32.mrf.mxu0  ;;  %v2147_v54 = vpop.f32.mrf.mxu1 }
 0x1d3   :  { %v2036_v56 = vadd.f32 %v2035_v0, %v2034_v49  ;;  %v1361_v63 = vadd.f32 %v2145_v55, %v1200_v53  ;;  %v2148_v2 = vadd.f32 %v2147_v54, %v2146_v52 }
 0x1d4   :  { %v2037_v57 = vpop.f32.mrf.mxu0  ;;  %v2149_v62 = vpop.f32.mrf.mxu1 }
 0x1d5   :  { %v1203_v1 = vadd.f32 %v2036_v56, %v2914_v59  ;;  %v1487_v9 = vmax.f32 %v1361_v63, 0.0 }
 0x1d6   :  { %v2038_v3 = vpop.f32.mrf.mxu0  ;;  %v2150_v4 = vpop.f32.mrf.mxu1 }
 0x1d7   :  { %v1364_v5 = vadd.f32 %v2148_v2, %v1203_v1  ;;  %v2039_v6 = vadd.f32 %v2038_v3, %v2037_v57  ;;  %v2151_v14 = vadd.f32 %v2150_v4, %v2149_v62 }
 0x1d8   :  { %v2040_v7 = vpop.f32.mrf.mxu0  ;;  %v2152_v8 = vpop.f32.mrf.mxu1 }
 0x1d9   :  { %v1488_v10 = vmax.f32 %v1364_v5, 0.0  ;;  %v1208_v11 = vadd.f32 %v2039_v6, %v2914_v59 }
 0x1da   :  { %v2041_v12 = vpop.f32.mrf.mxu0  ;;  %v2153_v13 = vpop.f32.mrf.mxu1 }
 0x1db   :  { %v2042_v15 = vadd.f32 %v2041_v12, %v2040_v7  ;;  %v1519_v16 = vpack.c.bf16 %v1488_v10, %v1487_v9  ;;  %v1369_v19 = vadd.f32 %v2151_v14, %v1208_v11  ;;  %v2154_v21 = vadd.f32 %v2153_v13, %v2152_v8 }
 0x1dc   :  { %v2043_v17 = vpop.f32.mrf.mxu0  ;;  %v2155_v18 = vpop.f32.mrf.mxu1 }
 0x1dd   :  { %v1211_v20 = vadd.f32 %v2042_v15, %v2914_v59  ;;  %2297 = vmatprep.mubr.bf16.mxu0 %v1519_v16  ;;  %v1489_v28 = vmax.f32 %v1369_v19, 0.0 }
 0x1de   :  { %v2044_v22 = vpop.f32.mrf.mxu0  ;;  %v2156_v23 = vpop.f32.mrf.mxu1 }
 0x1df   :  { %v1372_v24 = vadd.f32 %v2154_v21, %v1211_v20  ;;  %v2045_v25 = vadd.f32 %v2044_v22, %v2043_v17  ;;  %v2157_v34 = vadd.f32 %v2156_v23, %v2155_v18 }
 0x1e0   :  { %v2046_v26 = vpop.f32.mrf.mxu0  ;;  %v2158_v27 = vpop.f32.mrf.mxu1 }
 0x1e1   :  { %v1490_v29 = vmax.f32 %v1372_v24, 0.0  ;;  %v1216_v30 = vadd.f32 %v2045_v25, %v2914_v59 }
 0x1e2   :  { %v2047_v31 = vpop.f32.mrf.mxu0  ;;  %v2159_v32 = vpop.f32.mrf.mxu1 }
 0x1e3   :  { %v1520_v33 = vpack.c.bf16 %v1490_v29, %v1489_v28  ;;  %v2048_v35 = vadd.f32 %v2047_v31, %v2046_v26  ;;  %v1377_v38 = vadd.f32 %v2157_v34, %v1216_v30  ;;  %v2160_v40 = vadd.f32 %v2159_v32, %v2158_v27 }
 0x1e4   :  { %v2049_v36 = vpop.f32.mrf.mxu0  ;;  %v2161_v37 = vpop.f32.mrf.mxu1 }
 0x1e5   :  { %v1219_v39 = vadd.f32 %v2048_v35, %v2914_v59  ;;  %2298 = vmatmul.mubr.bf16.vlgmr.msra.gmra.mxu0 %v1520_v33  ;;  %v1491_v45 = vmax.f32 %v1377_v38, 0.0 }
 0x1e6   :  { %v2050_v41 = vpop.f32.mrf.mxu0  ;;  %v2162_v42 = vpop.f32.mrf.mxu1 }
 0x1e7   :  { %v1380_v43 = vadd.f32 %v2160_v40, %v1219_v39  ;;  %v2051_v60 = vadd.f32 %v2050_v41, %v2049_v36  ;;  %v2163_v49 = vadd.f32 %v2162_v42, %v2161_v37 }
 0x1e8   :  { %v2052_v44 = vpop.f32.mrf.mxu0  ;;  %v2164_v61 = vpop.f32.mrf.mxu1 }
 0x1e9   :  { %v1492_v58 = vmax.f32 %v1380_v43, 0.0  ;;  %v1224_v46 = vadd.f32 %v2051_v60, %v2914_v59 }
 0x1ea   :  { %v2053_v47 = vpop.f32.mrf.mxu0  ;;  %v2165_v48 = vpop.f32.mrf.mxu1 }
 0x1eb   :  { %v2054_v52 = vadd.f32 %v2053_v47, %v2052_v44  ;;  %v1521_v53 = vpack.c.bf16 %v1492_v58, %v1491_v45  ;;  %v1385_v55 = vadd.f32 %v2163_v49, %v1224_v46  ;;  %v2166_v57 = vadd.f32 %v2165_v48, %v2164_v61 }
 0x1ec   :  { %v2055_v0 = vpop.f32.mrf.mxu0  ;;  %v2167_v54 = vpop.f32.mrf.mxu1 }
 0x1ed   :  { %v1227_v56 = vadd.f32 %v2054_v52, %v2914_v59  ;;  %2301 = vmatprep.mubr.bf16.mxu0 %v1521_v53  ;;  %v1493_v5 = vmax.f32 %v1385_v55, 0.0 }
 0x1ee   :  { %v2056_v62 = vpop.f32.mrf.mxu0  ;;  %v2168_v63 = vpop.f32.mrf.mxu1 }
 0x1ef   :  { %v1388_v1 = vadd.f32 %v2166_v57, %v1227_v56  ;;  %v2057_v2 = vadd.f32 %v2056_v62, %v2055_v0  ;;  %v2169_v11 = vadd.f32 %v2168_v63, %v2167_v54 }
 0x1f0   :  { %v2058_v3 = vpop.f32.mrf.mxu0  ;;  %v2170_v4 = vpop.f32.mrf.mxu1 }
 0x1f1   :  { %v1494_v6 = vmax.f32 %v1388_v1, 0.0  ;;  %v1232_v7 = vadd.f32 %v2057_v2, %v2914_v59 }
 0x1f2   :  { %v2059_v8 = vpop.f32.mrf.mxu0  ;;  %v2171_v9 = vpop.f32.mrf.mxu1 }
 0x1f3   :  { %v1522_v10 = vpack.c.bf16 %v1494_v6, %v1493_v5  ;;  %v2060_v12 = vadd.f32 %v2059_v8, %v2058_v3  ;;  %v1393_v15 = vadd.f32 %v2169_v11, %v1232_v7  ;;  %v2172_v17 = vadd.f32 %v2171_v9, %v2170_v4 }
 0x1f4   :  { %v2061_v13 = vpop.f32.mrf.mxu0  ;;  %v2173_v14 = vpop.f32.mrf.mxu1 }
 0x1f5   :  { %v1235_v16 = vadd.f32 %v2060_v12, %v2914_v59  ;;  %2302 = vmatmul.mubr.bf16.gmra.mxu0 %v1522_v10  ;;  %v1495_v24 = vmax.f32 %v1393_v15, 0.0 }
 0x1f6   :  { %v2062_v18 = vpop.f32.mrf.mxu0  ;;  %v2174_v19 = vpop.f32.mrf.mxu1 }
 0x1f7   :  { %v1396_v20 = vadd.f32 %v2172_v17, %v1235_v16  ;;  %v2063_v21 = vadd.f32 %v2062_v18, %v2061_v13  ;;  %v2175_v29 = vadd.f32 %v2174_v19, %v2173_v14 }
 0x1f8   :  { %v2064_v22 = vpop.f32.mrf.mxu0  ;;  %v2176_v23 = vpop.f32.mrf.mxu1 }
 0x1f9   :  { %v1496_v25 = vmax.f32 %v1396_v20, 0.0  ;;  %v1240_v26 = vadd.f32 %v2063_v21, %v2914_v59 }
 0x1fa   :  { %v2065_v27 = vpop.f32.mrf.mxu0  ;;  %v2177_v28 = vpop.f32.mrf.mxu1 }
 0x1fb   :  { %v2066_v30 = vadd.f32 %v2065_v27, %v2064_v22  ;;  %v1523_v31 = vpack.c.bf16 %v1496_v25, %v1495_v24  ;;  %v1401_v34 = vadd.f32 %v2175_v29, %v1240_v26  ;;  %v2178_v36 = vadd.f32 %v2177_v28, %v2176_v23 }
 0x1fc   :  { %v2067_v32 = vpop.f32.mrf.mxu0  ;;  %v2179_v33 = vpop.f32.mrf.mxu1 }
 0x1fd   :  { %v1243_v35 = vadd.f32 %v2066_v30, %v2914_v59  ;;  %2305 = vmatprep.mubr.bf16.mxu0 %v1523_v31  ;;  %v1497_v43 = vmax.f32 %v1401_v34, 0.0 }
 0x1fe   :  { %v2068_v37 = vpop.f32.mrf.mxu0  ;;  %v2180_v38 = vpop.f32.mrf.mxu1 }
 0x1ff   :  { %v1404_v39 = vadd.f32 %v2178_v36, %v1243_v35  ;;  %v2069_v40 = vadd.f32 %v2068_v37, %v2067_v32  ;;  %v2181_v46 = vadd.f32 %v2180_v38, %v2179_v33 }
 0x200   :  { %v2070_v41 = vpop.f32.mrf.mxu0  ;;  %v2182_v42 = vpop.f32.mrf.mxu1 }
 0x201   :  { %v1498_v60 = vmax.f32 %v1404_v39, 0.0  ;;  %v1248_v44 = vadd.f32 %v2069_v40, %v2914_v59 }
 0x202   :  { %v2071_v61 = vpop.f32.mrf.mxu0  ;;  %v2183_v45 = vpop.f32.mrf.mxu1 }
 0x203   :  { %v1524_v58 = vpack.c.bf16 %v1498_v60, %v1497_v43  ;;  %v2072_v47 = vadd.f32 %v2071_v61, %v2070_v41  ;;  %v1409_v52 = vadd.f32 %v2181_v46, %v1248_v44  ;;  %v2184_v0 = vadd.f32 %v2183_v45, %v2182_v42 }
 0x204   :  { %v2073_v48 = vpop.f32.mrf.mxu0  ;;  %v2185_v49 = vpop.f32.mrf.mxu1 }
 0x205   :  { %v1251_v53 = vadd.f32 %v2072_v47, %v2914_v59  ;;  %2306 = vmatmul.mubr.bf16.gmra.mxu0 %v1524_v58  ;;  %v1499_v1 = vmax.f32 %v1409_v52, 0.0 }
 0x206   :  { %v2074_v54 = vpop.f32.mrf.mxu0  ;;  %v2186_v55 = vpop.f32.mrf.mxu1 }
 0x207   :  { %v1412_v56 = vadd.f32 %v2184_v0, %v1251_v53  ;;  %v2075_v57 = vadd.f32 %v2074_v54, %v2073_v48  ;;  %v2187_v6 = vadd.f32 %v2186_v55, %v2185_v49 }
 0x208   :  { %v2076_v62 = vpop.f32.mrf.mxu0  ;;  %v2188_v63 = vpop.f32.mrf.mxu1 }
 0x209   :  { %v1500_v2 = vmax.f32 %v1412_v56, 0.0  ;;  %v1256_v3 = vadd.f32 %v2075_v57, %v2914_v59 }
 0x20a   :  { %v2077_v4 = vpop.f32.mrf.mxu0  ;;  %v2189_v5 = vpop.f32.mrf.mxu1 }
 0x20b   :  { %v2078_v7 = vadd.f32 %v2077_v4, %v2076_v62  ;;  %v1525_v8 = vpack.c.bf16 %v1500_v2, %v1499_v1  ;;  %v1417_v11 = vadd.f32 %v2187_v6, %v1256_v3  ;;  %v2190_v13 = vadd.f32 %v2189_v5, %v2188_v63 }
 0x20c   :  { %v2079_v9 = vpop.f32.mrf.mxu0  ;;  %v2191_v10 = vpop.f32.mrf.mxu1 }
 0x20d   :  { %v1259_v12 = vadd.f32 %v2078_v7, %v2914_v59  ;;  %2309 = vmatprep.mubr.bf16.mxu0 %v1525_v8  ;;  %v1501_v20 = vmax.f32 %v1417_v11, 0.0 }
 0x20e   :  { %v2080_v14 = vpop.f32.mrf.mxu0  ;;  %v2192_v15 = vpop.f32.mrf.mxu1 }
 0x20f   :  { %v1420_v16 = vadd.f32 %v2190_v13, %v1259_v12  ;;  %v2081_v17 = vadd.f32 %v2080_v14, %v2079_v9  ;;  %v2193_v26 = vadd.f32 %v2192_v15, %v2191_v10 }
 0x210   :  { %v2082_v18 = vpop.f32.mrf.mxu0  ;;  %v2194_v19 = vpop.f32.mrf.mxu1 }
 0x211   :  { %v1502_v21 = vmax.f32 %v1420_v16, 0.0  ;;  %v1264_v22 = vadd.f32 %v2081_v17, %v2914_v59 }
 0x212   :  { %v2083_v23 = vpop.f32.mrf.mxu0  ;;  %v2195_v24 = vpop.f32.mrf.mxu1 }
 0x213   :  { %v1526_v25 = vpack.c.bf16 %v1502_v21, %v1501_v20  ;;  %v2084_v27 = vadd.f32 %v2083_v23, %v2082_v18  ;;  %v1425_v30 = vadd.f32 %v2193_v26, %v1264_v22  ;;  %v2196_v32 = vadd.f32 %v2195_v24, %v2194_v19 }
 0x214   :  { %v2085_v28 = vpop.f32.mrf.mxu0  ;;  %v2197_v29 = vpop.f32.mrf.mxu1 }
 0x215   :  { %v1267_v31 = vadd.f32 %v2084_v27, %v2914_v59  ;;  %2310 = vmatmul.mubr.bf16.gmra.mxu0 %v1526_v25  ;;  %v1503_v39 = vmax.f32 %v1425_v30, 0.0 }
 0x216   :  { %v2086_v33 = vpop.f32.mrf.mxu0  ;;  %v2198_v34 = vpop.f32.mrf.mxu1 }
 0x217   :  { %v1428_v35 = vadd.f32 %v2196_v32, %v1267_v31  ;;  %v2087_v36 = vadd.f32 %v2086_v33, %v2085_v28  ;;  %v2199_v60 = vadd.f32 %v2198_v34, %v2197_v29 }
 0x218   :  { %v2088_v37 = vpop.f32.mrf.mxu0  ;;  %v2200_v38 = vpop.f32.mrf.mxu1 }
 0x219   :  { %v1504_v40 = vmax.f32 %v1428_v35, 0.0  ;;  %v1272_v41 = vadd.f32 %v2087_v36, %v2914_v59 }
 0x21a   :  { %v2089_v42 = vpop.f32.mrf.mxu0  ;;  %v2201_v43 = vpop.f32.mrf.mxu1 }
 0x21b   :  { %v2090_v44 = vadd.f32 %v2089_v42, %v2088_v37  ;;  %v1527_v61 = vpack.c.bf16 %v1504_v40, %v1503_v39  ;;  %v1433_v46 = vadd.f32 %v2199_v60, %v1272_v41  ;;  %v2202_v48 = vadd.f32 %v2201_v43, %v2200_v38 }
 0x21c   :  { %v2091_v45 = vpop.f32.mrf.mxu0  ;;  %v2203_v58 = vpop.f32.mrf.mxu1 }
 0x21d   :  { %v1275_v47 = vadd.f32 %v2090_v44, %v2914_v59  ;;  %2313 = vmatprep.mubr.bf16.mxu0 %v1527_v61  ;;  %v1505_v56 = vmax.f32 %v1433_v46, 0.0 }
 0x21e   :  { %v2092_v49 = vpop.f32.mrf.mxu0  ;;  %v2204_v52 = vpop.f32.mrf.mxu1 }
 0x21f   :  { %v1436_v53 = vadd.f32 %v2202_v48, %v1275_v47  ;;  %v2093_v0 = vadd.f32 %v2092_v49, %v2091_v45  ;;  %v2205_v3 = vadd.f32 %v2204_v52, %v2203_v58 }
 0x220   :  { %v2094_v54 = vpop.f32.mrf.mxu0  ;;  %v2206_v55 = vpop.f32.mrf.mxu1 }
 0x221   :  { %v1506_v57 = vmax.f32 %v1436_v53, 0.0  ;;  %v1280_v62 = vadd.f32 %v2093_v0, %v2914_v59 }
 0x222   :  { %v2095_v63 = vpop.f32.mrf.mxu0  ;;  %v2207_v1 = vpop.f32.mrf.mxu1 }
 0x223   :  { %v1528_v2 = vpack.c.bf16 %v1506_v57, %v1505_v56  ;;  %v2096_v4 = vadd.f32 %v2095_v63, %v2094_v54  ;;  %v1441_v7 = vadd.f32 %v2205_v3, %v1280_v62  ;;  %v2208_v9 = vadd.f32 %v2207_v1, %v2206_v55 }
 0x224   :  { %v2097_v5 = vpop.f32.mrf.mxu0  ;;  %v2209_v6 = vpop.f32.mrf.mxu1 }
 0x225   :  { %v1283_v8 = vadd.f32 %v2096_v4, %v2914_v59  ;;  %2314 = vmatmul.mubr.bf16.gmra.mxu0 %v1528_v2  ;;  %v1507_v16 = vmax.f32 %v1441_v7, 0.0 }
 0x226   :  { %v2098_v10 = vpop.f32.mrf.mxu0  ;;  %v2210_v11 = vpop.f32.mrf.mxu1 }
 0x227   :  { %v1444_v12 = vadd.f32 %v2208_v9, %v1283_v8  ;;  %v2099_v13 = vadd.f32 %v2098_v10, %v2097_v5  ;;  %v2211_v21 = vadd.f32 %v2210_v11, %v2209_v6 }
 0x228   :  { %v2100_v14 = vpop.f32.mrf.mxu0  ;;  %v2212_v15 = vpop.f32.mrf.mxu1 }
 0x229   :  { %v1508_v17 = vmax.f32 %v1444_v12, 0.0  ;;  %v1288_v18 = vadd.f32 %v2099_v13, %v2914_v59 }
 0x22a   :  { %v2101_v19 = vpop.f32.mrf.mxu0  ;;  %v2213_v20 = vpop.f32.mrf.mxu1 }
 0x22b   :  { %v2102_v22 = vadd.f32 %v2101_v19, %v2100_v14  ;;  %v1529_v23 = vpack.c.bf16 %v1508_v17, %v1507_v16  ;;  %v1449_v26 = vadd.f32 %v2211_v21, %v1288_v18  ;;  %v2214_v28 = vadd.f32 %v2213_v20, %v2212_v15 }
 0x22c   :  { %v2103_v24 = vpop.f32.mrf.mxu0  ;;  %v2215_v25 = vpop.f32.mrf.mxu1 }
 0x22d   :  { %v1291_v27 = vadd.f32 %v2102_v22, %v2914_v59  ;;  %2317 = vmatprep.mubr.bf16.mxu0 %v1529_v23  ;;  %v1509_v35 = vmax.f32 %v1449_v26, 0.0 }
 0x22e   :  { %v2104_v29 = vpop.f32.mrf.mxu0  ;;  %v2216_v30 = vpop.f32.mrf.mxu1 }
 0x22f   :  { %v1452_v31 = vadd.f32 %v2214_v28, %v1291_v27  ;;  %v2105_v32 = vadd.f32 %v2104_v29, %v2103_v24  ;;  %v2217_v41 = vadd.f32 %v2216_v30, %v2215_v25 }
 0x230   :  { %v2106_v33 = vpop.f32.mrf.mxu0  ;;  %v2218_v34 = vpop.f32.mrf.mxu1 }
 0x231   :  { %v1510_v36 = vmax.f32 %v1452_v31, 0.0  ;;  %v1296_v37 = vadd.f32 %v2105_v32, %v2914_v59 }
 0x232   :  { %v2107_v38 = vpop.f32.mrf.mxu0  ;;  %v2219_v39 = vpop.f32.mrf.mxu1 }
 0x233   :  { %v1530_v40 = vpack.c.bf16 %v1510_v36, %v1509_v35  ;;  %v2108_v42 = vadd.f32 %v2107_v38, %v2106_v33  ;;  %v1457_v44 = vadd.f32 %v2217_v41, %v1296_v37  ;;  %v2220_v45 = vadd.f32 %v2219_v39, %v2218_v34 }
 0x234   :  { %v2109_v43 = vpop.f32.mrf.mxu0  ;;  %v2221_v60 = vpop.f32.mrf.mxu1 }
 0x235   :  { %v1299_v61 = vadd.f32 %v2108_v42, %v2914_v59  ;;  %2318 = vmatmul.mubr.bf16.gmra.mxu0 %v1530_v40  ;;  %v1511_v53 = vmax.f32 %v1457_v44, 0.0 }
 0x236   :  { %v2110_v58 = vpop.f32.mrf.mxu0  ;;  %v2222_v46 = vpop.f32.mrf.mxu1 }
 0x237   :  { %v1460_v47 = vadd.f32 %v2220_v45, %v1299_v61  ;;  %v2111_v48 = vadd.f32 %v2110_v58, %v2109_v43  ;;  %v2223_v57 = vadd.f32 %v2222_v46, %v2221_v60  ;;  %v2951_v45 = vld [vmem:[%s3057_s6] ss:$0 sm:$0xff] }
 0x238   :  { %v2112_v49 = vpop.f32.mrf.mxu0  ;;  %v2224_v52 = vpop.f32.mrf.mxu1 }
 0x239   :  { %v1512_v0 = vmax.f32 %v1460_v47, 0.0  ;;  %v1304_v54 = vadd.f32 %v2111_v48, %v2914_v59 }
 0x23a   :  { %v2113_v55 = vpop.f32.mrf.mxu0  ;;  %v2225_v56 = vpop.f32.mrf.mxu1 }
 0x23b   :  { %v2114_v62 = vadd.f32 %v2113_v55, %v2112_v49  ;;  %v1531_v63 = vpack.c.bf16 %v1512_v0, %v1511_v53  ;;  %v1465_v3 = vadd.f32 %v2223_v57, %v1304_v54  ;;  %v2226_v5 = vadd.f32 %v2225_v56, %v2224_v52 }
 0x23c   :  { %v2115_v1 = vpop.f32.mrf.mxu0  ;;  %v2227_v2 = vpop.f32.mrf.mxu1 }
 0x23d   :  { %v1307_v4 = vadd.f32 %v2114_v62, %v2914_v59  ;;  %2321 = vmatprep.mubr.bf16.mxu0 %v1531_v63  ;;  %v1513_v12 = vmax.f32 %v1465_v3, 0.0 }
 0x23e   :  { %v2116_v6 = vpop.f32.mrf.mxu0  ;;  %v2228_v7 = vpop.f32.mrf.mxu1 }
 0x23f   :  { %v1468_v8 = vadd.f32 %v2226_v5, %v1307_v4  ;;  %v2117_v9 = vadd.f32 %v2116_v6, %v2115_v1  ;;  %v2229_v18 = vadd.f32 %v2228_v7, %v2227_v2 }
 0x240   :  { %v2118_v10 = vpop.f32.mrf.mxu0  ;;  %v2230_v11 = vpop.f32.mrf.mxu1 }
 0x241   :  { %v1514_v13 = vmax.f32 %v1468_v8, 0.0  ;;  %v1312_v14 = vadd.f32 %v2117_v9, %v2914_v59 }
 0x242   :  { %v2119_v15 = vpop.f32.mrf.mxu0  ;;  %v2231_v16 = vpop.f32.mrf.mxu1 }
 0x243   :  { %v1532_v17 = vpack.c.bf16 %v1514_v13, %v1513_v12  ;;  %v2120_v19 = vadd.f32 %v2119_v15, %v2118_v10  ;;  %v1473_v22 = vadd.f32 %v2229_v18, %v1312_v14  ;;  %v2232_v24 = vadd.f32 %v2231_v16, %v2230_v11  ;;  %v2978_v18 = vld [vmem:[%s3058_s7] sm:$0x1] }
 0x244   :  { %v2121_v20 = vpop.f32.mrf.mxu0  ;;  %v2233_v21 = vpop.f32.mrf.mxu1  ;;  %2279 = vmatprep.mubr.msk.bf16.mxu1 %vm1818_vm0, %v2978_v18 }
 0x245   :  { %v1315_v23 = vadd.f32 %v2120_v19, %v2914_v59  ;;  %2322 = vmatmul.mubr.bf16.gmra.mxu0 %v1532_v17  ;;  %v1515_v31 = vmax.f32 %v1473_v22, 0.0 }
 0x246   :  { %v2122_v25 = vpop.f32.mrf.mxu0  ;;  %v2234_v26 = vpop.f32.mrf.mxu1 }
 0x247   :  { %v1476_v27 = vadd.f32 %v2232_v24, %v1315_v23  ;;  %v2123_v28 = vadd.f32 %v2122_v25, %v2121_v20  ;;  %v2235_v36 = vadd.f32 %v2234_v26, %v2233_v21 }
 0x248   :  { %v2124_v29 = vpop.f32.mrf.mxu0  ;;  %v2236_v30 = vpop.f32.mrf.mxu1 }
 0x249   :  { %v1516_v32 = vmax.f32 %v1476_v27, 0.0  ;;  %v1320_v33 = vadd.f32 %v2123_v28, %v2914_v59 }
 0x24a   :  { %v2125_v34 = vpop.f32.mrf.mxu0  ;;  %v2237_v35 = vpop.f32.mrf.mxu1 }
 0x24b   :  { %v2126_v37 = vadd.f32 %v2125_v34, %v2124_v29  ;;  %v1533_v38 = vpack.c.bf16 %v1516_v32, %v1515_v31  ;;  %v1481_v39 = vadd.f32 %v2235_v36, %v1320_v33  ;;  %v2238_v41 = vadd.f32 %v2237_v35, %v2236_v30 }
 0x24d   :  { %v1323_v40 = vadd.f32 %v2126_v37, %v2914_v59  ;;  %2325 = vmatprep.mubr.bf16.mxu0 %v1533_v38  ;;  %v1517_v43 = vmax.f32 %v1481_v39, 0.0 }
 0x24f   :  { %v1484_v42 = vadd.f32 %v2238_v41, %v1323_v40 }
 0x251   :  { %v1518_v60 = vmax.f32 %v1484_v42, 0.0 }
 0x253   :  { %v1534_v44 = vpack.c.bf16 %v1518_v60, %v1517_v43 }
 0x255   :  { %2326 = vmatmul.mubr.bf16.gmra.mxu0 %v1534_v44 }
 0x2a5   :  { %v2299_v61 = vpop.f32.mrf.mxu0 }
 0x2a6   :  { %v1649_v46 = vadd.f32 %v2299_v61, %v2951_v45 }
 0x2a7   :  { %v1640_v58 = vpop.f32.mrf.mxu0 }
 0x2a8   :  { %v1641_v48 = vadd.f32 %v2951_v45, %v1640_v58  ;;  %v1769_v52 = vmax.f32 %v1649_v46, 0.0 }
 0x2a9   :  { %v2300_v47 = vpop.f32.mrf.mxu0 }
 0x2aa   :  { %v1652_v59 = vadd.f32 %v2300_v47, %v2951_v45  ;;  %v1767_v54 = vmax.f32 %v1641_v48, 0.0 }
 0x2ab   :  { %v1643_v49 = vpop.f32.mrf.mxu0 }
 0x2ac   :  { %v1770_v53 = vmax.f32 %v1652_v59, 0.0  ;;  %v1644_v0 = vadd.f32 %v2951_v45, %v1643_v49 }
 0x2ae   :  { %v2957_v55 = vpack.c.bf16 %v1770_v53, %v1769_v52  ;;  %v1768_v56 = vmax.f32 %v1644_v0, 0.0 }
 0x2b0   :  { %v2959_v57 = vpack.c.bf16 %v1768_v56, %v1767_v54 }
 0x2b5   :  { %v2303_v62 = vpop.f32.mrf.mxu0 }
 0x2b6   :  { %v1665_v1 = vadd.f32 %v2303_v62, %v2951_v45 }
 0x2b7   :  { %v1656_v63 = vpop.f32.mrf.mxu0 }
 0x2b8   :  { %v1657_v3 = vadd.f32 %v2951_v45, %v1656_v63  ;;  %v1773_v6 = vmax.f32 %v1665_v1, 0.0 }
 0x2b9   :  { %v2304_v2 = vpop.f32.mrf.mxu0 }
 0x2ba   :  { %v1668_v4 = vadd.f32 %v2304_v2, %v2951_v45  ;;  %v1771_v9 = vmax.f32 %v1657_v3, 0.0 }
 0x2bb   :  { %v1659_v5 = vpop.f32.mrf.mxu0 }
 0x2bc   :  { %v1774_v7 = vmax.f32 %v1668_v4, 0.0  ;;  %v1660_v8 = vadd.f32 %v2951_v45, %v1659_v5 }
 0x2be   :  { %v2965_v10 = vpack.c.bf16 %v1774_v7, %v1773_v6  ;;  %v1772_v11 = vmax.f32 %v1660_v8, 0.0 }
 0x2c0   :  { %v2967_v12 = vpack.c.bf16 %v1772_v11, %v1771_v9 }
 0x2c5   :  { %v2969_v13 = vpop.f32.mrf.mxu0 }
 0x2c7   :  { %v2971_v14 = vpop.f32.mrf.mxu0 }
 0x2c9   :  { %v2308_v15 = vpop.f32.mrf.mxu0 }
 0x2cb   :  { %v2973_v16 = vpop.f32.mrf.mxu0 }
 0x2d5   :  { %v2311_v17 = vpop.f32.mrf.mxu0 }
 0x2d6   :  { %v1697_v61 = vadd.f32 %v2311_v17, %v2951_v45  ;;  %v1684_v17 = vadd.f32 %v2308_v15, %v2951_v45  ;;  %v1676_v15 = vadd.f32 %v2951_v45, %v2973_v16 }
 0x2d7   :  { %v1688_v19 = vpop.f32.mrf.mxu0 }
 0x2d8   :  { %v1781_v59 = vmax.f32 %v1697_v61, 0.0  ;;  %v1689_v1 = vadd.f32 %v2951_v45, %v1688_v19 }
 0x2d9   :  { %v2312_v20 = vpop.f32.mrf.mxu0 }
 0x2da   :  { %v1700_v60 = vadd.f32 %v2312_v20, %v2951_v45  ;;  %v1779_v9 = vmax.f32 %v1689_v1, 0.0 }
 0x2db   :  { %v1691_v21 = vpop.f32.mrf.mxu0 }
 0x2dc   :  { %v1782_v46 = vmax.f32 %v1700_v60, 0.0  ;;  %v1692_v53 = vadd.f32 %v2951_v45, %v1691_v21  ;;  %v1681_v21 = vadd.f32 %v2969_v13, %v2951_v45  ;;  %v1673_v13 = vadd.f32 %v2951_v45, %v2971_v14 }
 0x2de   :  { %v1806_v54 = vpack.c.bf16 %v1782_v46, %v1781_v59  ;;  %v1780_v5 = vmax.f32 %v1692_v53, 0.0 }
 0x2e0   :  { %v1844_v8 = vsel %vm1818_vm0, %v1806_v54, 0  ;;  %v1805_v19 = vpack.c.bf16 %v1780_v5, %v1779_v9 }
 0x2e5   :  { %v2315_v22 = vpop.f32.mrf.mxu0 }
 0x2e6   :  { %v1713_v24 = vadd.f32 %v2315_v22, %v2951_v45 }
 0x2e7   :  { %v1704_v23 = vpop.f32.mrf.mxu0 }
 0x2e8   :  { %v1705_v26 = vadd.f32 %v2951_v45, %v1704_v23  ;;  %v1785_v29 = vmax.f32 %v1713_v24, 0.0  ;;  %v1778_v23 = vmax.f32 %v1684_v17, 0.0 }
 0x2e9   :  { %v2316_v25 = vpop.f32.mrf.mxu0 }
 0x2ea   :  { %v1716_v27 = vadd.f32 %v2316_v25, %v2951_v45  ;;  %v1783_v32 = vmax.f32 %v1705_v26, 0.0  ;;  %v1841_v26 = vsel %vm1818_vm0, %v1805_v19, 0 }
 0x2eb   :  { %v1707_v28 = vpop.f32.mrf.mxu0 }
 0x2ec   :  { %v1786_v30 = vmax.f32 %v1716_v27, 0.0  ;;  %v1708_v31 = vadd.f32 %v2951_v45, %v1707_v28  ;;  %v1777_v27 = vmax.f32 %v1681_v21, 0.0 }
 0x2ee   :  { %v2986_v33 = vpack.c.bf16 %v1786_v30, %v1785_v29  ;;  %v1784_v34 = vmax.f32 %v1708_v31, 0.0  ;;  %v1804_v29 = vpack.c.bf16 %v1778_v23, %v1777_v27 }
 0x2f0   :  { %v2988_v35 = vpack.c.bf16 %v1784_v34, %v1783_v32  ;;  %v1776_v32 = vmax.f32 %v1676_v15, 0.0 }
 0x2f5   :  { %v2319_v36 = vpop.f32.mrf.mxu0 }
 0x2f7   :  { %v2990_v37 = vpop.f32.mrf.mxu0 }
 0x2f9   :  { %v2320_v38 = vpop.f32.mrf.mxu0 }
 0x2fa   :  { %v1732_v34 = vadd.f32 %v2320_v38, %v2951_v45  ;;  %v1721_v38 = vadd.f32 %v2951_v45, %v2990_v37  ;;  %v2484_v37 = vmov 1966171168  }
 0x2fb   :  { %v2992_v39 = vpop.f32.mrf.mxu0 }
 0x2fc   :  { %v1724_v14 = vadd.f32 %v2951_v45, %v2992_v39  ;;  %v1829_v39 = vsel %vm1818_vm0, %v2967_v12, 0  ;;  %v1915_v12 = vunpack.c.l.s4 %v2484_v37 }
 0x2fe   :  { %v1788_v46 = vmax.f32 %v1724_v14, 0.0  ;;  %v1916_v59 = vunpack.c.0.s8 %v1915_v12 }
 0x305   :  { %v2323_v40 = vpop.f32.mrf.mxu0 }
 0x306   :  { %v1745_v11 = vadd.f32 %v2323_v40, %v2951_v45 }
 0x307   :  { %v1736_v41 = vpop.f32.mrf.mxu0 }
 0x308   :  { %v1793_v22 = vmax.f32 %v1745_v11, 0.0  ;;  %v1737_v28 = vadd.f32 %v2951_v45, %v1736_v41  ;;  %v1729_v41 = vadd.f32 %v2319_v36, %v2951_v45 }
 0x309   :  { %v2324_v42 = vpop.f32.mrf.mxu0 }
 0x30a   :  { %v1748_v6 = vadd.f32 %v2324_v42, %v2951_v45  ;;  %v1791_v31 = vmax.f32 %v1737_v28, 0.0  ;;  %v1838_v42 = vsel %vm1818_vm0, %v1804_v29, 0  ;;  %v1789_v16 = vmax.f32 %v1729_v41, 0.0 }
 0x30b   :  { %v1739_v43 = vpop.f32.mrf.mxu0 }
 0x30c   :  { %v1794_v20 = vmax.f32 %v1748_v6, 0.0  ;;  %v1740_v25 = vadd.f32 %v2951_v45, %v1739_v43  ;;  %v1775_v43 = vmax.f32 %v1673_v13, 0.0 }
 0x30e   :  { %v1812_v24 = vpack.c.bf16 %v1794_v20, %v1793_v22  ;;  %v1792_v30 = vmax.f32 %v1740_v25, 0.0  ;;  %v1803_v60 = vpack.c.bf16 %v1776_v32, %v1775_v43 }
 0x310   :  { %v1811_v40 = vpack.c.bf16 %v1792_v30, %v1791_v31 }
 0x315   :  { %v2327_v44 = vpop.f32.mrf.mxu0 }
 0x316   :  { %v1761_v47 = vadd.f32 %v2327_v44, %v2951_v45  ;;  %v1790_v44 = vmax.f32 %v1732_v34, 0.0 }
 0x317   :  { %v1752_v58 = vpop.f32.mrf.mxu0 }
 0x318   :  { %v1753_v49 = vadd.f32 %v2951_v45, %v1752_v58  ;;  %v1797_v56 = vmax.f32 %v1761_v47, 0.0  ;;  %v1810_v61 = vpack.c.bf16 %v1790_v44, %v1789_v16  ;;  %v1835_v58 = vsel %vm1818_vm0, %v1803_v60, 0 }
 0x319   :  { %v2328_v48 = vpop.f32.mrf.mxu0  ;;  %v1787_v47 = vmax.f32 %v1721_v38, 0.0 }
 0x31a   :  { %v1764_v52 = vadd.f32 %v2328_v48, %v2951_v45  ;;  %v1795_v2 = vmax.f32 %v1753_v49, 0.0  ;;  %v1832_v48 = vsel %vm1818_vm0, %v2965_v10, 0  ;;  %v1823_v10 = vsel %vm1818_vm0, %v2959_v57, 0 }
 0x31b   :  { %v1755_v0 = vpop.f32.mrf.mxu0  ;;  %v1809_v36 = vpack.c.bf16 %v1788_v46, %v1787_v47 }
 0x31c   :  { %v1798_v62 = vmax.f32 %v1764_v52, 0.0  ;;  %v1756_v63 = vadd.f32 %v2951_v45, %v1755_v0  ;;  %v1826_v45 = vsel %vm1818_vm0, %v2957_v55, 0 }
 0x31e   :  { %v1814_v3 = vpack.c.bf16 %v1798_v62, %v1797_v56  ;;  %v1796_v4 = vmax.f32 %v1756_v63, 0.0 }
 0x320   :  { %v1813_v7 = vpack.c.bf16 %v1796_v4, %v1795_v2  ;;  %2329 = vmatprep.subr.msk.bf16.mxu1 %vm1818_vm0, %v1814_v3 }
 0x321   :  { %2264 = vmatpush3.bf16.xpose.msra.mxu1 %v1844_v8 }
 0x322   :  { %2330 = vmatprep.subr.msk.bf16.mxu1 %vm1818_vm0, %v1813_v7 }
 0x329   :  { %2266 = vmatpush3.bf16.xpose.msra.mxu1 %v1841_v26 }
 0x32a   :  { %2331 = vmatprep.subr.msk.bf16.mxu1 %vm1818_vm0, %v1812_v24 }
 0x331   :  { %2268 = vmatpush3.bf16.xpose.msra.mxu1 %v1838_v42 }
 0x332   :  { %2332 = vmatprep.subr.msk.bf16.mxu1 %vm1818_vm0, %v1811_v40 }
 0x339   :  { %2270 = vmatpush3.bf16.xpose.msra.mxu1 %v1835_v58 }
 0x33a   :  { %2333 = vmatprep.subr.msk.bf16.mxu1 %vm1818_vm0, %v1810_v61 }
 0x341   :  { %2272 = vmatpush3.bf16.xpose.msra.mxu1 %v1832_v48 }
 0x342   :  { %2334 = vmatprep.subr.msk.bf16.mxu1 %vm1818_vm0, %v1809_v36 }
 0x349   :  { %2274 = vmatpush3.bf16.xpose.msra.mxu1 %v1829_v39 }
 0x34a   :  { %2335 = vmatprep.subr.msk.bf16.mxu1 %vm1818_vm0, %v2986_v33  ;;  %v1817_v33 = vstv %s3059_s8 }
 0x351   :  { %2276 = vmatpush3.bf16.xpose.msra.mxu1 %v1826_v45 }
 0x352   :  { %2336 = vmatprep.subr.msk.bf16.mxu1 %vm1818_vm0, %v2988_v35  ;;  %v1919_v35 = vsub.s32 %v1916_v59, %v2766_v51 }
 0x359   :  { %2278 = vmatpush3.bf16.xpose.msra.mxu1 %v1823_v10 }
 0x360   :  { %2280 = vmatmul.mubr.msk.bf16.vlgmr.msra.gmra.mxu1 %vm1818_vm0, %v2978_v18 }
 0x420   :  { %v1904_v49 = vpop.f32.mrf.mxu1 }
 0x421   :  { %v1905_v52 = vadd.f32 %v1904_v49, %v1817_v33 }
 0x422   :  { %v1906_v55 = vpop.f32.mrf.mxu1 }
 0x423   :  { %v1907_v53 = vadd.f32 %v1906_v55, %v1817_v33 }
 0x424   :  { %v1908_v0 = vpop.f32.mrf.mxu1 }
 0x425   :  { %v1913_v54 = vcombine.low %v1905_v52, %v1907_v53 }
 0x426   :  { %v1909_v57 = vpop.f32.mrf.mxu1 }
 0x427   :  { %v1920_v56 = vrot.slane %v1913_v54, %v1919_v35 }
 0x429   :  { %v1927_v18 = vrot.slane %v1920_v56, %v1919_v35 }
 0x42b   :  { %1933 = vst.msk [vmem:[%s3060_s9] sm:$0x3] %vm1931_vm1, %v1927_v18 }
 0x42c   :  { %1938 = vsyncpa [#allocation4], 1 }
 0x42d   :  { %1939 = vsyncpa [#allocation6], 1 }

</bundles_post_ra>
